<compile_context>
chip_gen: v7x
topology: tpu7x:2x2x1
jax: 0.10.0
libtpu: 0.0.40
codegen_flags: <defaults>
</compile_context>

<pallas_src>
import functools

import jax
import jax.numpy as jnp
from jax.experimental import pallas as pl
from jax.experimental.pallas import tpu as pltpu


def _round_up(a, m):
    return m * ((a + m - 1) // m)


def gcn_v_fused_kernel(x_self_ref, adj_ref, x_all_ref, w1_ref, w2_ref, b_ref,
                       wf_ref, bf_ref, alpha_ref,
                       gcn_ref, fc_ref, agg_acc,
                       *, n_total, tk, mask_k):
    """Grid = (row_tiles [parallel], N_tiles [arbitrary, contraction]).

    Accumulates agg = A[:dst] @ x over the contraction axis; on the last k step it
    runs the fused GraphConv + FC + PReLU + L2-normalize epilogue on the row tile.
    """
    k = pl.program_id(1)

    @pl.when(k == 0)
    def _():
        agg_acc[...] = jnp.zeros_like(agg_acc)

    a = adj_ref[...]
    xk = x_all_ref[...]
    if mask_k:
        # Ragged edge tile on the contraction axis: zero both the out-of-range adj
        # columns and the matching x rows (0*0, never 0*garbage).
        col = k * tk + jax.lax.broadcasted_iota(jnp.int32, a.shape, 1)
        a = jnp.where(col < n_total, a, 0.0)
        row = k * tk + jax.lax.broadcasted_iota(jnp.int32, xk.shape, 0)
        xk = jnp.where(row < n_total, xk, 0.0)

    # MeanAggregator partial sum: (TM, TK) @ (TK, D) on the MXU, f32 accumulate.
    agg_acc[...] += jnp.dot(a, xk, preferred_element_type=jnp.float32)

    @pl.when(k == pl.num_programs(1) - 1)
    def _():
        # GraphConv: x_tile @ W1 + agg_tile @ W2 + b   (two K=D dots, no concat copy)
        h = (jnp.dot(x_self_ref[...], w1_ref[...], preferred_element_type=jnp.float32)
             + jnp.dot(agg_acc[...], w2_ref[...], preferred_element_type=jnp.float32)
             + b_ref[...])
        g = jnp.maximum(h, 0.0)                       # ReLU
        gcn_ref[...] = g

        # fc = PReLU(g @ Wf + bf); fcfeat = L2-normalize(fc, dim=1)
        f = jnp.dot(g, wf_ref[...], preferred_element_type=jnp.float32) + bf_ref[...]
        f = jnp.where(f >= 0.0, f, alpha_ref[...] * f)        # per-channel PReLU
        sumsq = jnp.sum(f * f, axis=1, keepdims=True)
        # 1/max(norm, 1e-12) == rsqrt(max(sumsq, 1e-24)); rsqrt runs on the EUP slot.
        fc_ref[...] = f * jax.lax.rsqrt(jnp.maximum(sumsq, 1e-24))


def gcn_v_forward(x, adj, params, dst_num, *, tm=256, tk=1024):
    """Returns (fcfeat, gcnfeat) of the output_feat=True forward path."""
    N, D = x.shape
    assert adj.shape == (N, N)
    H = params["w_cat"].shape[1]

    # --- tile-size selection (static) ---------------------------------------
    # Lane axis of the adj tile must be 128-aligned; never larger than needed.
    tk = min(tk, _round_up(N, 128))
    # Keep >= 2 row tiles whenever possible so the parallel axis can shard across
    # both TensorCores on v7x; sublane axis must stay a multiple of 8.
    while tm > 128 and pl.cdiv(dst_num, tm) < 2:
        tm //= 2
    tm = min(tm, _round_up(dst_num, 8))

    grid = (pl.cdiv(dst_num, tm), pl.cdiv(N, tk))
    mask_k = (N % tk) != 0          # only the ragged contraction edge needs masking;
                                    # OOB garbage in edge *row* tiles stays confined to
                                    # rows >= dst_num, whose writes Pallas discards.

    # GraphConv weight halves (tiny, one-time split; in practice stored this way).
    w1 = params["w_cat"][:D]            # (D, H) acts on x
    w2 = params["w_cat"][D:]            # (D, H) acts on A @ x
    b, wf, bf, alpha = params["b"], params["wf"], params["bf"], params["alpha"]

    kernel = functools.partial(gcn_v_fused_kernel, n_total=N, tk=tk, mask_k=mask_k)

    gcnfeat, fcfeat = pl.pallas_call(
        kernel,
        out_shape=(jax.ShapeDtypeStruct((dst_num, H), jnp.float32),
                   jax.ShapeDtypeStruct((dst_num, H), jnp.float32)),
        grid_spec=pltpu.PrefetchScalarGridSpec(
            num_scalar_prefetch=0,
            grid=grid,
            in_specs=[
                pl.BlockSpec((tm, D), lambda i, k: (i, 0)),    # x   (dst-row prefix tile)
                pl.BlockSpec((tm, tk), lambda i, k: (i, k)),   # adj tile (dominant stream)
                pl.BlockSpec((tk, D), lambda i, k: (k, 0)),    # x   (contraction tile)
                pl.BlockSpec((D, H), lambda i, k: (0, 0)),     # W1  (VMEM-resident)
                pl.BlockSpec((D, H), lambda i, k: (0, 0)),     # W2
                pl.BlockSpec((1, H), lambda i, k: (0, 0)),     # b
                pl.BlockSpec((H, H), lambda i, k: (0, 0)),     # Wf
                pl.BlockSpec((1, H), lambda i, k: (0, 0)),     # bf
                pl.BlockSpec((1, H), lambda i, k: (0, 0)),     # alpha
            ],
            out_specs=[
                pl.BlockSpec((tm, H), lambda i, k: (i, 0)),    # gcnfeat
                pl.BlockSpec((tm, H), lambda i, k: (i, 0)),    # fcfeat
            ],
            scratch_shapes=[pltpu.VMEM((tm, D), jnp.float32)],  # A@x accumulator
        ),
        compiler_params=pltpu.CompilerParams(
            dimension_semantics=("parallel", "arbitrary"),
            vmem_limit_bytes=32 * 1024 * 1024,   # fits all of v5e/v6e/v7x with headroom
        ),
    )(x, adj, x, w1, w2, b, wf, bf, alpha)

    # forward(..., output_feat=True) returns (fcfeat, gcnfeat, 0, 0, 0, 0, 0, 0)
    return fcfeat, gcnfeat


def reference_forward(x, adj, params, dst_num):
    """Pure-JAX f32 reference matching the PyTorch module."""
    agg = adj @ x
    h = jnp.concatenate([x, agg], axis=1) @ params["w_cat"] + params["b"]
    g = jnp.maximum(h, 0.0)[:dst_num]
    f = g @ params["wf"] + params["bf"]
    f = jnp.where(f >= 0.0, f, params["alpha"] * f)
    nrm = jnp.sqrt(jnp.sum(f * f, axis=1, keepdims=True))
    return f / jnp.maximum(nrm, 1e-12), g


def init_params(key, feature_dim, nhid):
    k1, k2, k3 = jax.random.split(key, 3)
    # GraphConv weight: (2*feature_dim, nhid) xavier_uniform-style (stacked [W1; W2]).
    limit_g = jnp.sqrt(6.0 / (2 * feature_dim + nhid))
    w_cat = jax.random.uniform(k1, (2 * feature_dim, nhid), jnp.float32, -limit_g, limit_g)
    b = jnp.zeros((1, nhid), jnp.float32)
    # fc: nn.Linear(nhid, nhid) + nn.PReLU(nhid) with alpha init 0.25.
    limit_f = jnp.sqrt(1.0 / nhid)
    wf = jax.random.uniform(k2, (nhid, nhid), jnp.float32, -limit_f, limit_f)
    bf = jax.random.uniform(k3, (1, nhid), jnp.float32, -limit_f, limit_f)
    alpha = jnp.full((1, nhid), 0.25, jnp.float32)
    return {"w_cat": w_cat, "b": b, "wf": wf, "bf": bf, "alpha": alpha}


if __name__ == "__main__":
    key = jax.random.PRNGKey(0)
    kx, ka, kp = jax.random.split(key, 3)

    N = 512          # total nodes in the subgraph
    D = 128          # feature_dim (lane-dense)
    H = 128          # nhid       (lane-dense)
    dst_num = 256    # len(label): number of destination nodes

    x = jax.random.normal(kx, (N, D), jnp.float32)

    # dense adjacency, row-normalized (MeanAggregator expects a normalized A)
    a_raw = (jax.random.uniform(ka, (N, N)) > 0.6).astype(jnp.float32)
    a_raw = a_raw + jnp.eye(N, dtype=jnp.float32)
    adj = a_raw / (jnp.sum(a_raw, axis=1, keepdims=True) + 1e-6)

    params = init_params(kp, D, H)

    fcfeat, gcnfeat = gcn_v_forward(x, adj, params, dst_num)
    jax.block_until_ready((fcfeat, gcnfeat))

    assert fcfeat.shape == (dst_num, H)
    assert gcnfeat.shape == (dst_num, H)

    fc_ref, gcn_ref = reference_forward(x, adj, params, dst_num)
    assert bool(jnp.all(jnp.isfinite(fcfeat))) and bool(jnp.all(jnp.isfinite(gcnfeat)))
    # All-f32 operands now -> much tighter tolerance than the old bf16 version.
    assert bool(jnp.allclose(gcnfeat, gcn_ref, rtol=2e-2, atol=2e-2))
    assert bool(jnp.allclose(fcfeat, fc_ref, rtol=2e-2, atol=2e-2))

    print("KERNEL_OK")
</pallas_src>

<mosaic_0001>
module attributes {stable_mosaic.version = 11 : i64} {
  func.func @gcn_v_fused_kernel(%arg0: i32, %arg1: i32, %arg2: memref<128x128xf32, #tpu.memory_space<vmem>>, %arg3: memref<128x512xf32, #tpu.memory_space<vmem>>, %arg4: memref<512x128xf32, #tpu.memory_space<vmem>>, %arg5: memref<128x128xf32, #tpu.memory_space<vmem>>, %arg6: memref<128x128xf32, #tpu.memory_space<vmem>>, %arg7: memref<1x128xf32, #tpu.memory_space<vmem>>, %arg8: memref<128x128xf32, #tpu.memory_space<vmem>>, %arg9: memref<1x128xf32, #tpu.memory_space<vmem>>, %arg10: memref<1x128xf32, #tpu.memory_space<vmem>>, %arg11: memref<128x128xf32, #tpu.memory_space<vmem>>, %arg12: memref<128x128xf32, #tpu.memory_space<vmem>>, %arg13: memref<128x128xf32, #tpu.memory_space<vmem>>) attributes {dimension_semantics = [#tpu.dimension_semantics<parallel>, #tpu.dimension_semantics<arbitrary>], iteration_bounds = array<i64: 2, 1>, scalar_prefetch = 0 : i64, scratch_operands = 1 : i64, tpu.core_type = #tpu.core_type<tc>, window_params = [{transform_indices = @transform_0, window_bounds = array<i64: 128, 128>}, {transform_indices = @transform_1, window_bounds = array<i64: 128, 512>}, {transform_indices = @transform_2, window_bounds = array<i64: 512, 128>}, {pipeline_mode = #tpu.pipeline_mode<synchronous>, transform_indices = @transform_3, window_bounds = array<i64: 128, 128>}, {pipeline_mode = #tpu.pipeline_mode<synchronous>, transform_indices = @transform_4, window_bounds = array<i64: 128, 128>}, {pipeline_mode = #tpu.pipeline_mode<synchronous>, transform_indices = @transform_5, window_bounds = array<i64: 1, 128>}, {pipeline_mode = #tpu.pipeline_mode<synchronous>, transform_indices = @transform_6, window_bounds = array<i64: 128, 128>}, {pipeline_mode = #tpu.pipeline_mode<synchronous>, transform_indices = @transform_7, window_bounds = array<i64: 1, 128>}, {pipeline_mode = #tpu.pipeline_mode<synchronous>, transform_indices = @transform_8, window_bounds = array<i64: 1, 128>}, {transform_indices = @transform_9, window_bounds = array<i64: 128, 128>}, {transform_indices = @transform_10, window_bounds = array<i64: 128, 128>}]} {
    %c0_i32 = arith.constant 0 : i32
    %0 = arith.cmpi eq, %arg1, %c0_i32 : i32
    %1 = arith.extui %0 : i1 to i32
    %c0_i32_0 = arith.constant 0 : i32
    %2 = arith.cmpi ne, %1, %c0_i32_0 : i32
    scf.if %2 {
      %cst_10 = arith.constant 0.000000e+00 : f32
      %12 = vector.broadcast %cst_10 : f32 to vector<128x128xf32>
      %c0_11 = arith.constant 0 : index
      %c0_12 = arith.constant 0 : index
      %13 = vector.load %arg13[%c0_11, %c0_12] : memref<128x128xf32, #tpu.memory_space<vmem>>, vector<128x128xf32>
      tpu.vector_store %arg13[%c0_11, %c0_12], %12 {strides = array<i32>} : memref<128x128xf32, #tpu.memory_space<vmem>>, vector<128x128xf32>,
    } else {
    }
    %c0 = arith.constant 0 : index
    %c0_1 = arith.constant 0 : index
    %3 = vector.load %arg3[%c0, %c0_1] : memref<128x512xf32, #tpu.memory_space<vmem>>, vector<128x512xf32>
    %c0_2 = arith.constant 0 : index
    %c0_3 = arith.constant 0 : index
    %4 = vector.load %arg4[%c0_2, %c0_3] : memref<512x128xf32, #tpu.memory_space<vmem>>, vector<512x128xf32>
    %c0_4 = arith.constant 0 : index
    %c0_5 = arith.constant 0 : index
    %5 = vector.load %arg13[%c0_4, %c0_5] : memref<128x128xf32, #tpu.memory_space<vmem>>, vector<128x128xf32>
    %cst = arith.constant dense<0.000000e+00> : vector<128x128xf32>
    %6 = tpu.matmul %3, %4, %cst {dimension_numbers = #tpu.dot_dimension_numbers<[1], [0], [0], [1], [0, 0, 1, 1], [], []>} : vector<128x512xf32>, vector<512x128xf32>, vector<128x128xf32> -> vector<128x128xf32>
    %7 = arith.addf %5, %6 : vector<128x128xf32>
    %c0_6 = arith.constant 0 : index
    %c0_7 = arith.constant 0 : index
    %8 = vector.load %arg13[%c0_6, %c0_7] : memref<128x128xf32, #tpu.memory_space<vmem>>, vector<128x128xf32>
    tpu.vector_store %arg13[%c0_6, %c0_7], %7 {strides = array<i32>} : memref<128x128xf32, #tpu.memory_space<vmem>>, vector<128x128xf32>,
    %c0_i32_8 = arith.constant 0 : i32
    %9 = arith.cmpi eq, %arg1, %c0_i32_8 : i32
    %10 = arith.extui %9 : i1 to i32
    %c0_i32_9 = arith.constant 0 : i32
    %11 = arith.cmpi ne, %10, %c0_i32_9 : i32
    scf.if %11 {
      %c0_10 = arith.constant 0 : index
      %c0_11 = arith.constant 0 : index
      %12 = vector.load %arg2[%c0_10, %c0_11] : memref<128x128xf32, #tpu.memory_space<vmem>>, vector<128x128xf32>
      %c0_12 = arith.constant 0 : index
      %c0_13 = arith.constant 0 : index
      %13 = vector.load %arg5[%c0_12, %c0_13] : memref<128x128xf32, #tpu.memory_space<vmem>>, vector<128x128xf32>
      %cst_14 = arith.constant dense<0.000000e+00> : vector<128x128xf32>
      %14 = tpu.matmul %12, %13, %cst_14 {dimension_numbers = #tpu.dot_dimension_numbers<[1], [0], [0], [1], [0, 0, 1, 1], [], []>} : vector<128x128xf32>, vector<128x128xf32>, vector<128x128xf32> -> vector<128x128xf32>
      %c0_15 = arith.constant 0 : index
      %c0_16 = arith.constant 0 : index
      %15 = vector.load %arg13[%c0_15, %c0_16] : memref<128x128xf32, #tpu.memory_space<vmem>>, vector<128x128xf32>
      %c0_17 = arith.constant 0 : index
      %c0_18 = arith.constant 0 : index
      %16 = vector.load %arg6[%c0_17, %c0_18] : memref<128x128xf32, #tpu.memory_space<vmem>>, vector<128x128xf32>
      %cst_19 = arith.constant dense<0.000000e+00> : vector<128x128xf32>
      %17 = tpu.matmul %15, %16, %cst_19 {dimension_numbers = #tpu.dot_dimension_numbers<[1], [0], [0], [1], [0, 0, 1, 1], [], []>} : vector<128x128xf32>, vector<128x128xf32>, vector<128x128xf32> -> vector<128x128xf32>
      %18 = arith.addf %14, %17 : vector<128x128xf32>
      %c0_20 = arith.constant 0 : index
      %c0_21 = arith.constant 0 : index
      %19 = vector.load %arg7[%c0_20, %c0_21] : memref<1x128xf32, #tpu.memory_space<vmem>>, vector<1x128xf32>
      %20 = vector.broadcast %19 : vector<1x128xf32> to vector<128x128xf32>
      %21 = arith.addf %18, %20 : vector<128x128xf32>
      %cst_22 = arith.constant 0.000000e+00 : f32
      %22 = vector.broadcast %cst_22 : f32 to vector<128x128xf32>
      %23 = arith.maximumf %21, %22 : vector<128x128xf32>
      %c0_23 = arith.constant 0 : index
      %c0_24 = arith.constant 0 : index
      %24 = vector.load %arg11[%c0_23, %c0_24] : memref<128x128xf32, #tpu.memory_space<vmem>>, vector<128x128xf32>
      tpu.vector_store %arg11[%c0_23, %c0_24], %23 {strides = array<i32>} : memref<128x128xf32, #tpu.memory_space<vmem>>, vector<128x128xf32>,
      %c0_25 = arith.constant 0 : index
      %c0_26 = arith.constant 0 : index
      %25 = vector.load %arg8[%c0_25, %c0_26] : memref<128x128xf32, #tpu.memory_space<vmem>>, vector<128x128xf32>
      %cst_27 = arith.constant dense<0.000000e+00> : vector<128x128xf32>
      %26 = tpu.matmul %23, %25, %cst_27 {dimension_numbers = #tpu.dot_dimension_numbers<[1], [0], [0], [1], [0, 0, 1, 1], [], []>} : vector<128x128xf32>, vector<128x128xf32>, vector<128x128xf32> -> vector<128x128xf32>
      %c0_28 = arith.constant 0 : index
      %c0_29 = arith.constant 0 : index
      %27 = vector.load %arg9[%c0_28, %c0_29] : memref<1x128xf32, #tpu.memory_space<vmem>>, vector<1x128xf32>
      %28 = vector.broadcast %27 : vector<1x128xf32> to vector<128x128xf32>
      %29 = arith.addf %26, %28 : vector<128x128xf32>
      %cst_30 = arith.constant 0.000000e+00 : f32
      %30 = vector.broadcast %cst_30 : f32 to vector<128x128xf32>
      %31 = arith.cmpf oge, %29, %30 : vector<128x128xf32>
      %c0_31 = arith.constant 0 : index
      %c0_32 = arith.constant 0 : index
      %32 = vector.load %arg10[%c0_31, %c0_32] : memref<1x128xf32, #tpu.memory_space<vmem>>, vector<1x128xf32>
      %33 = vector.broadcast %32 : vector<1x128xf32> to vector<128x128xf32>
      %34 = arith.mulf %33, %29 : vector<128x128xf32>
      %35 = arith.select %31, %29, %34 : vector<128x128xi1>, vector<128x128xf32>
      %36 = arith.mulf %35, %35 : vector<128x128xf32>
      %cst_33 = arith.constant dense<0.000000e+00> : vector<128xf32>
      %37 = vector.multi_reduction <add>, %36, %cst_33 [1] : vector<128x128xf32> to vector<128xf32>
      %38 = vector.shape_cast %37 : vector<128xf32> to vector<128x1xf32>
      %cst_34 = arith.constant 1.000000e-24 : f32
      %39 = vector.broadcast %cst_34 : f32 to vector<128x1xf32>
      %40 = arith.maximumf %38, %39 : vector<128x1xf32>
      %41 = math.rsqrt %40 : vector<128x1xf32>
      %42 = vector.broadcast %41 : vector<128x1xf32> to vector<128x128xf32>
      %43 = arith.mulf %35, %42 : vector<128x128xf32>
      %c0_35 = arith.constant 0 : index
      %c0_36 = arith.constant 0 : index
      %44 = vector.load %arg12[%c0_35, %c0_36] : memref<128x128xf32, #tpu.memory_space<vmem>>, vector<128x128xf32>
      tpu.vector_store %arg12[%c0_35, %c0_36], %43 {strides = array<i32>} : memref<128x128xf32, #tpu.memory_space<vmem>>, vector<128x128xf32>,
    } else {
    }
    return
  }
  func.func @transform_0(%arg0: i32, %arg1: i32) -> (i32, i32) {
    %c0_i32 = arith.constant 0 : i32
    %c0_i32_0 = arith.constant 0 : i32
    return %arg0, %c0_i32 : i32, i32
  }
  func.func @transform_1(%arg0: i32, %arg1: i32) -> (i32, i32) {
    %c0_i32 = arith.constant 0 : i32
    return %arg0, %arg1 : i32, i32
  }
  func.func @transform_2(%arg0: i32, %arg1: i32) -> (i32, i32) {
    %c0_i32 = arith.constant 0 : i32
    %c0_i32_0 = arith.constant 0 : i32
    return %arg1, %c0_i32 : i32, i32
  }
  func.func @transform_3(%arg0: i32, %arg1: i32) -> (i32, i32) {
    %c0_i32 = arith.constant 0 : i32
    %c0_i32_0 = arith.constant 0 : i32
    %c0_i32_1 = arith.constant 0 : i32
    return %c0_i32, %c0_i32_0 : i32, i32
  }
  func.func @transform_4(%arg0: i32, %arg1: i32) -> (i32, i32) {
    %c0_i32 = arith.constant 0 : i32
    %c0_i32_0 = arith.constant 0 : i32
    %c0_i32_1 = arith.constant 0 : i32
    return %c0_i32, %c0_i32_0 : i32, i32
  }
  func.func @transform_5(%arg0: i32, %arg1: i32) -> (i32, i32) {
    %c0_i32 = arith.constant 0 : i32
    %c0_i32_0 = arith.constant 0 : i32
    %c0_i32_1 = arith.constant 0 : i32
    return %c0_i32, %c0_i32_0 : i32, i32
  }
  func.func @transform_6(%arg0: i32, %arg1: i32) -> (i32, i32) {
    %c0_i32 = arith.constant 0 : i32
    %c0_i32_0 = arith.constant 0 : i32
    %c0_i32_1 = arith.constant 0 : i32
    return %c0_i32, %c0_i32_0 : i32, i32
  }
  func.func @transform_7(%arg0: i32, %arg1: i32) -> (i32, i32) {
    %c0_i32 = arith.constant 0 : i32
    %c0_i32_0 = arith.constant 0 : i32
    %c0_i32_1 = arith.constant 0 : i32
    return %c0_i32, %c0_i32_0 : i32, i32
  }
  func.func @transform_8(%arg0: i32, %arg1: i32) -> (i32, i32) {
    %c0_i32 = arith.constant 0 : i32
    %c0_i32_0 = arith.constant 0 : i32
    %c0_i32_1 = arith.constant 0 : i32
    return %c0_i32, %c0_i32_0 : i32, i32
  }
  func.func @transform_9(%arg0: i32, %arg1: i32) -> (i32, i32) {
    %c0_i32 = arith.constant 0 : i32
    %c0_i32_0 = arith.constant 0 : i32
    return %arg0, %c0_i32 : i32, i32
  }
  func.func @transform_10(%arg0: i32, %arg1: i32) -> (i32, i32) {
    %c0_i32 = arith.constant 0 : i32
    %c0_i32_0 = arith.constant 0 : i32
    return %arg0, %c0_i32 : i32, i32
  }
}

</mosaic_0001>

<bundles_post_ra>
// kernel: tpu_custom_call.1
= control target key start
LH: loop header
LB: loop body
LE: loop exit
PB: predicated region body
PF: predicated region fallthrough
CT: control target
= control target key end

     0   :  { %s3804_s0 = inlined_call_operand.hbm [shape: f32[512,128], index: 0, kind: input, shape index: {}]   ;;  %s3805_s1 = inlined_call_operand.hbm [shape: f32[512,512], index: 1, kind: input, shape index: {}]   ;;  %s3806_s2 = inlined_call_operand.hbm [shape: f32[512,128], index: 2, kind: input, shape index: {}]   ;;  %s3807_s3 = inlined_call_operand.hbm [shape: f32[128,128], index: 3, kind: input, shape index: {}]   ;;  %s3808_s4 = inlined_call_operand.hbm [shape: f32[128,128], index: 4, kind: input, shape index: {}]   ;;  %s3809_s5 = inlined_call_operand.vmem [shape: f32[1,128], index: 5, kind: input, shape index: {}]   ;;  %s3810_s6 = inlined_call_operand.hbm [shape: f32[128,128], index: 6, kind: input, shape index: {}]   ;;  %s3811_s7 = inlined_call_operand.vmem [shape: f32[1,128], index: 7, kind: input, shape index: {}]   ;;  %s3812_s8 = inlined_call_operand.vmem [shape: f32[1,128], index: 8, kind: input, shape index: {}]   ;;  %s3813_s9 = inlined_call_operand.hbm [shape: f32[256,128], index: 9, kind: output, shape index: {0}]   ;;  %s3814_s10 = inlined_call_operand.hbm [shape: f32[256,128], index: 10, kind: output, shape index: {1}]  }
   0x1   :  { %3824 = sst [smem:[#allocation27_spill]] %s3804_s0 }
   0x2   :  { %3825 = sst [smem:[#allocation28_spill]] %s3806_s2 }
   0x3   :  { %3826 = sst [smem:[#allocation29_spill]] %s3807_s3 }
   0x4   :  { %3827 = sst [smem:[#allocation30_spill]] %s3808_s4 }
   0x5   :  { %3828 = sst [smem:[#allocation31_spill]] %s3812_s8 }
   0x6   :  { %3829 = sst [smem:[#allocation32_spill]] %s3813_s9 }
   0x7   :  { %3830 = sst [smem:[#allocation33_spill]] %s3814_s10 }
   0x8   :  { %16 = vsyncpa [#allocation4], 0 }
   0x9   :  { %18 = vsyncpa [#allocation4 + $0x1], 0 }
   0xa   :  { %19 = vsyncpa [#allocation7], 0 }
   0xb   :  { %21 = vsyncpa [#allocation7 + $0x1], 0 }
   0xc   :  { %22 = vsyncpa [#allocation10], 0 }
   0xd   :  { %23 = vsyncpa [#allocation13], 0 }
   0xe   :  { %24 = vsyncpa [#allocation5], 0 }
   0xf   :  { %26 = vsyncpa [#allocation5 + $0x1], 0 }
  0x10   :  { %27 = vsyncpa [#allocation16], 0 }
  0x11   :  { %29 = vsyncpa [#allocation16 + $0x1], 0  ;;  %s3129_s13 = smov 0   ;;  %s3131_s14 = smov 0  }
  0x12   :  { %s3133_s15 = smov 0   ;;  %s3135_s16 = smov 0  }
  0x13   :  { %s3137_s17 = smov 0   ;;  %s3139_s18 = smov 0  }
  0x14 LB: > { %3831 = sst [smem:[#allocation24_spill]] %s3038_s13  ;;  %s3160_s19 = sadd.s32 4294967295, %s3058_s18   ;;  %s3058_s18 = sphi %s3139_s18, %s35_s18   ;;  %s3054_s17 = sphi %s3137_s17, %s3869_s17   ;;  %s3050_s16 = sphi %s3135_s16, %s3868_s16   ;;  %s3046_s15 = sphi %s3133_s15, %s3867_s15   ;;  %s3042_s14 = sphi %s3131_s14, %s3866_s14   ;;  %s3038_s13 = sphi %s3129_s13, %s3865_s13  }
  0x15   : > { %3832 = sst [smem:[#allocation25_spill]] %s3050_s16  ;;  %s1966_s20 = sadd.s32 4294967294, %s3058_s18  }
  0x16   : > { %p67_p0 = scmp.ne.s32.totalorder %s3042_s14, %s3038_s13  ;;  %p3817_p1 = scmp.eq.s32.totalorder %s3160_s19, 0 }
  0x17   : > { %p277_p3 = scmp.eq.s32.totalorder %s1966_s20, 1  ;;  %p1967_p5 = scmp.ge.s32.totalorder %s3058_s18, 1 }
  0x18   : > { %p3169_p4 = por %p3817_p1, %p67_p0  ;;  %p310_p7 = scmp.lt.s32.totalorder %s3058_s18, 3 }
  0x19   : > { %p3174_p6 = por %p277_p3, %p67_p0  ;;  %s3060_s24 = smov [#allocation8]  }
  0x1a   : > { %s3833_s21 = scalar_select %p3169_p4, 1, 0 }
  0x1b   : > { %s3834_s22 = scalar_select %p3174_p6, 1, 0 }
  0x1c   : > { %p3179_p8 = pnand %p1967_p5, %p310_p7  ;;  %s325_s25 = sshll.u32 %s3060_s24, 4  ;;  %s3183_s25 = int_to_ptr.vmem [resolvable:$true] %s325_s25 }
  0x1d   : > { %3835 = sst [smem:[#allocation26_spill]] %s3834_s22  ;;  %s3061_s27 = smov [#allocation9]  }
  0x1e   : > { %s3836_s23 = scalar_select %p3179_p8, 1, 0 }
  0x1f   : > { %p2629_p9 = pneg %p3179_p8  ;;  %s338_s28 = sshll.u32 %s3061_s27, 4  ;;  %s3194_s28 = int_to_ptr.vmem [resolvable:$true] %s338_s28 }
  0x20   : > { %s3062_s29 = smov [#allocation11]   ;;  %s3838_s2 = sld [smem:[#allocation28_spill]] }
  0x21   : > { %p3190_p11 = pnand %p2629_p9, %p3817_p1  ;;  %s3196_s30 = sshll.u32 %s3062_s29, 4  ;;  %s352_s30 = int_to_ptr.vmem [resolvable:$true] %s3196_s30 }
  0x23   : > { %p3206_p13 = pneg %p3190_p11 }
  0x26   : > { %s2756_s20 = scalar_lea.hbm %s3838_s2, 8192 }
  0x27   : > { %p2757_p12 = scmp.ne.s32.totalorder %s3838_s2, %s2756_s20  ;;  %p2763_p5 = scmp.lt.u32.totalorder %s2756_s20, %s3838_s2 }
  0x29   : > { %p2759_p0 = pnand %p3206_p13, %p2757_p12 }
  0x2b   : > { %p2760_p3 = pneg %p2759_p0 }
  0x2d   : > { %p2765_p7 = pnand %p2763_p5, %p2760_p3 }
  0x2f   : > { %2768 = shalt.err (!%p2765_p7)
}
  0x30   : > { %s2769_s22 = scalar_lea.vmem %s3183_s25, 8192  ;;  %p2777_p2 = scmp.lt.s32.totalorder %s3183_s25, %s3183_s25 }
  0x31   : > { %p2770_p9 = scmp.ne.s32.totalorder %s3183_s25, %s2769_s22  ;;  %p2778_p6 = scmp.lt.s32.totalorder %s2769_s22, %s2769_s22 }
  0x33   : > { %p2772_p10 = pnand %p2770_p9, %p3206_p13  ;;  %p2779_p12 = por %p2778_p6, %p2777_p2 }
  0x35   : > { %p2773_p1 = pneg %p2772_p10 }
  0x37   : > { %p2780_p0 = pnand %p2779_p12, %p2773_p1 }
  0x39   : > { %2783 = shalt.err (!%p2780_p0)
}
  0x3a   : > { %s3823_s11 = smov 128   ;;  %s3064_s12 = smov 8  }
  0x3b   : > { %2632 = dma.hbm_to_vmem [thread:$0]  (!%p3190_p11), %s3838_s2, 8192, %s3183_s25, [#allocation7], %s3823_s11, %s3823_s11, %s3064_s12  }
  0x3c   : > { %s3840_s3 = sld [smem:[#allocation29_spill]] }
  0x42   : > { %s2784_s22 = scalar_lea.hbm %s3840_s3, 2048 }
  0x43   : > { %p2785_p1 = scmp.ne.s32.totalorder %s3840_s3, %s2784_s22  ;;  %p2791_p10 = scmp.lt.u32.totalorder %s2784_s22, %s3840_s3 }
  0x45   : > { %p2787_p2 = pnand %p2785_p1, %p3206_p13 }
  0x47   : > { %p2788_p6 = pneg %p2787_p2 }
  0x49   : > { %p2793_p3 = pnand %p2791_p10, %p2788_p6 }
  0x4b   : > { %2796 = shalt.err (!%p2793_p3)
}
  0x4c   : > { %s2797_s25 = scalar_lea.vmem %s3194_s28, 2048  ;;  %p2805_p12 = scmp.lt.s32.totalorder %s3194_s28, %s3194_s28 }
  0x4d   : > { %p2798_p5 = scmp.ne.s32.totalorder %s3194_s28, %s2797_s25  ;;  %p2806_p0 = scmp.lt.s32.totalorder %s2797_s25, %s2797_s25 }
  0x4f   : > { %p2800_p7 = pnand %p2798_p5, %p3206_p13  ;;  %p2807_p1 = por %p2806_p0, %p2805_p12 }
  0x51   : > { %p2801_p9 = pneg %p2800_p7 }
  0x53   : > { %p2808_p2 = pnand %p2807_p1, %p2801_p9 }
  0x55   : > { %2811 = shalt.err (!%p2808_p2)
}
  0x56   : > { %2635 = dma.hbm_to_vmem [thread:$0]  (!%p3190_p11), %s3840_s3, 2048, %s3194_s28, [#allocation10], %s3823_s11, %s3823_s11, %s3064_s12  }
  0x57   : > { %s3841_s4 = sld [smem:[#allocation30_spill]] }
  0x5d   : > { %s2812_s20 = scalar_lea.hbm %s3841_s4, 2048 }
  0x5e   : > { %p2813_p6 = scmp.ne.s32.totalorder %s3841_s4, %s2812_s20  ;;  %p2819_p5 = scmp.lt.u32.totalorder %s2812_s20, %s3841_s4 }
  0x60   : > { %p2815_p10 = pnand %p2813_p6, %p3206_p13 }
  0x62   : > { %p2816_p3 = pneg %p2815_p10 }
  0x64   : > { %p2821_p7 = pnand %p2819_p5, %p2816_p3 }
  0x66   : > { %2824 = shalt.err (!%p2821_p7)
}
  0x67   : > { %s2825_s25 = scalar_lea.vmem %s352_s30, 2048  ;;  %p2833_p1 = scmp.lt.s32.totalorder %s352_s30, %s352_s30 }
  0x68   : > { %p2826_p9 = scmp.ne.s32.totalorder %s352_s30, %s2825_s25  ;;  %p2834_p2 = scmp.lt.s32.totalorder %s2825_s25, %s2825_s25 }
  0x6a   : > { %p2828_p12 = pnand %p2826_p9, %p3206_p13  ;;  %p2835_p4 = por %p2834_p2, %p2833_p1 }
  0x6c   : > { %p2829_p0 = pneg %p2828_p12 }
  0x6e   : > { %p2836_p8 = pnand %p2835_p4, %p2829_p0 }
  0x70   : > { %2839 = shalt.err (!%p2836_p8)
}
  0x71   : > { %2638 = dma.hbm_to_vmem [thread:$0]  (!%p3190_p11), %s3841_s4, 2048, %s352_s30, [#allocation10], %s3823_s11, %s3823_s11, %s3064_s12  }
  0x72   : > { %s3065_s9 = smov [#allocation12]   ;;  %s2840_s24 = scalar_lea.hbm %s3810_s6, 2048 }
  0x73   : > { %s367_s10 = sshll.u32 %s3065_s9, 4  ;;  %p2841_p4 = scmp.ne.s32.totalorder %s3810_s6, %s2840_s24  ;;  %s368_s10 = int_to_ptr.vmem [resolvable:$true] %s367_s10 }
  0x74   : > { %p2847_p10 = scmp.lt.u32.totalorder %s2840_s24, %s3810_s6 }
  0x75   : > { %p2843_p8 = pnand %p2841_p4, %p3206_p13 }
  0x77   : > { %p2844_p6 = pneg %p2843_p8 }
  0x79   : > { %p2849_p3 = pnand %p2847_p10, %p2844_p6 }
  0x7b   : > { %2852 = shalt.err (!%p2849_p3)
}
  0x7c   : > { %s2853_s30 = scalar_lea.vmem %s368_s10, 2048  ;;  %p2861_p12 = scmp.lt.s32.totalorder %s368_s10, %s368_s10 }
  0x7d   : > { %p2854_p5 = scmp.ne.s32.totalorder %s368_s10, %s2853_s30  ;;  %p2862_p0 = scmp.lt.s32.totalorder %s2853_s30, %s2853_s30 }
  0x7f   : > { %p2856_p7 = pnand %p2854_p5, %p3206_p13  ;;  %p2863_p1 = por %p2862_p0, %p2861_p12 }
  0x81   : > { %p2857_p9 = pneg %p2856_p7 }
  0x83   : > { %p2864_p2 = pnand %p2863_p1, %p2857_p9 }
  0x85   : > { %2867 = shalt.err (!%p2864_p2)
}
  0x86   : > { %2641 = dma.hbm_to_vmem [thread:$0]  (!%p3190_p11), %s3810_s6, 2048, %s368_s10, [#allocation13], %s3823_s11, %s3823_s11, %s3064_s12  }
  0x87   : > { %s47_s13 = sadd.s32 1, %s3054_s17  ;;  %s54_s26 = sadd.s32 1, %s3046_s15 }
  0x88   : > { %p49_p13 = scmp.ge.s32.totalorder %s47_s13, 2  ;;  %p61_p4 = scmp.ne.s32.totalorder %s3046_s15, %s3042_s14 }
  0x89   : > { %p62_p8 = scmp.eq.s32.totalorder %s3058_s18, 0  ;;  %p2660_p6 = scmp.lt.s32.totalorder %s3058_s18, 2 }
  0x8a   : > { %s3871_s13 = smov (%p49_p13, %s47_s13), 0  ;;  %p3842_p3 = scmp.eq.s32.totalorder %s3160_s19, 1 }
  0x8b   : > { %p63_p10 = por %p62_p8, %p61_p4  ;;  %s51_s16 = ssub.s32 %s3054_s17, %s3871_s13 }
  0x8c   : > { %p3309_p5 = por %p3842_p3, %p61_p4  ;;  %s3316_s20 = sand.u32 1, %s3046_s15  }
  0x8d   : > { %p52_p11 = scmp.eq.s32.totalorder %s51_s16, 0  ;;  %s1973_s10 = sshll.u32 %s3316_s20, 7 }
  0x8e   : > { %s2000_s24 = sshll.u32 %s3054_s17, 11  ;;  %s3844_s0 = sld [smem:[#allocation27_spill]] }
  0x8f   : > { %s3321_s27 = scalar_select %p52_p11, %s3046_s15, %s54_s26  }
  0x90   : > { %s391_s30 = scalar_lea.vmem [#allocation3], %s1973_s10  ;;  %p3330_p7 = pnand %p2660_p6, %p63_p10 }
  0x91   : > { %s398_s28 = sshll.u32 %s391_s30, 4  ;;  %s388_s16 = scalar_lea.sflag [#allocation4], %s3316_s20  ;;  %s3334_s28 = int_to_ptr.vmem [resolvable:$true] %s398_s28 }
  0x92   : > { %p2870_p12 = pneg %p3330_p7 }
  0x94   : > { %s3326_s25 = scalar_lea.hbm %s3844_s0, %s2000_s24  ;;  %s2873_s22 = scalar_lea.hbm %s3844_s0, 8192 }
  0x95   : > { %s2868_s29 = scalar_lea.hbm %s3326_s25, 2048  ;;  %p2874_p2 = scmp.lt.u32.totalorder %s3326_s25, %s3844_s0 }
  0x96   : > { %p2869_p9 = scmp.ne.s32.totalorder %s3326_s25, %s2868_s29  ;;  %p2875_p13 = scmp.lt.u32.totalorder %s2873_s22, %s2868_s29 }
  0x97   : > { %p2877_p8 = scmp.lt.u32.totalorder %s2868_s29, %s3326_s25 }
  0x98   : > { %p2871_p0 = pnand %p2870_p12, %p2869_p9  ;;  %p2876_p4 = por %p2875_p13, %p2874_p2 }
  0x9a   : > { %p2872_p1 = pneg %p2871_p0  ;;  %p2878_p6 = por %p2877_p8, %p2876_p4 }
  0x9c   : > { %p2879_p10 = pnand %p2878_p6, %p2872_p1 }
  0x9e   : > { %2882 = shalt.err (!%p2879_p10)
}
  0x9f   : > { %s2883_s26 = scalar_lea.vmem %s3334_s28, 2048  ;;  %s3066_s10 = smov [#allocation3]  }
  0xa0   : > { %p2884_p3 = scmp.ne.s32.totalorder %s3334_s28, %s2883_s26  ;;  %s2888_s24 = sshll.u32 %s3066_s10, 4  ;;  %s2889_s24 = int_to_ptr.vmem [resolvable:$false] %s2888_s24 }
  0xa1   : > { %s2890_s11 = scalar_lea.vmem %s2889_s24, 4096  ;;  %p2891_p0 = scmp.lt.s32.totalorder %s3334_s28, %s2889_s24 }
  0xa2   : > { %p2886_p11 = pnand %p2884_p3, %p2870_p12  ;;  %p2892_p2 = scmp.lt.s32.totalorder %s2890_s11, %s2883_s26 }
  0xa4   : > { %p2887_p9 = pneg %p2886_p11  ;;  %p2893_p13 = por %p2892_p2, %p2891_p0 }
  0xa6   : > { %p2894_p4 = pnand %p2893_p13, %p2887_p9 }
  0xa8   : > { %2897 = shalt.err (!%p2894_p4)
}
  0xa9   : > { %s3846_s29 = smov 128   ;;  %s1976_s22 = sshll.u32 %s3316_s20, 9 }
  0xaa   : > { %2645 = dma.hbm_to_vmem [thread:$0]  (!%p3330_p7), %s3326_s25, 2048, %s3334_s28, %s388_s16, %s3846_s29, %s3846_s29, %s3064_s12  }
  0xab   : > { %s2002_s30 = sshll.u32 %s3054_s17, 13  ;;  %s412_s11 = scalar_lea.vmem [#allocation6], %s1976_s22 }
  0xac   : > { %s3373_s24 = scalar_lea.hbm %s3805_s1, %s2002_s30  ;;  %s422_s0 = sshll.u32 %s412_s11, 4  ;;  %s3375_s0 = int_to_ptr.vmem [resolvable:$true] %s422_s0 }
  0xad   : > { %s3847_s2 = sand.u32 1, %s3058_s18   ;;  %s2898_s4 = scalar_lea.hbm %s3373_s24, 8192 }
  0xae   : > { %s3379_s3 = scalar_lea.sflag [#allocation7], %s3847_s2  ;;  %p2899_p1 = scmp.ne.s32.totalorder %s3373_s24, %s2898_s4 }
  0xaf   : > { %s2903_s25 = scalar_lea.hbm %s3805_s1, 32768  ;;  %p2904_p10 = scmp.lt.u32.totalorder %s3373_s24, %s3805_s1 }
  0xb0   : > { %p2901_p8 = pnand %p2899_p1, %p2870_p12  ;;  %p2905_p3 = scmp.lt.u32.totalorder %s2903_s25, %s2898_s4 }
  0xb1   : > { %p2907_p9 = scmp.lt.u32.totalorder %s2898_s4, %s3373_s24 }
  0xb2   : > { %p2902_p6 = pneg %p2901_p8  ;;  %p2906_p11 = por %p2905_p3, %p2904_p10 }
  0xb4   : > { %p2908_p0 = por %p2907_p9, %p2906_p11 }
  0xb6   : > { %p2909_p2 = pnand %p2908_p0, %p2902_p6 }
  0xb8   : > { %2912 = shalt.err (!%p2909_p2)
}
  0xb9   : > { %s2913_s2 = scalar_lea.vmem %s3375_s0, 8192  ;;  %s3067_s29 = smov [#allocation6]  }
  0xba   : > { %p2914_p13 = scmp.ne.s32.totalorder %s3375_s0, %s2913_s2  ;;  %s2918_s22 = sshll.u32 %s3067_s29, 4  ;;  %s2919_s22 = int_to_ptr.vmem [resolvable:$false] %s2918_s22 }
  0xbb   : > { %s2920_s30 = scalar_lea.vmem %s2919_s22, 16384  ;;  %p2921_p8 = scmp.lt.s32.totalorder %s3375_s0, %s2919_s22 }
  0xbc   : > { %p2916_p4 = pnand %p2914_p13, %p2870_p12  ;;  %p2922_p10 = scmp.lt.s32.totalorder %s2920_s30, %s2913_s2 }
  0xbe   : > { %p2917_p1 = pneg %p2916_p4  ;;  %p2923_p3 = por %p2922_p10, %p2921_p8 }
  0xc0   : > { %p2924_p11 = pnand %p2923_p3, %p2917_p1 }
  0xc2   : > { %2927 = shalt.err (!%p2924_p11)
}
  0xc3   : > { %s3068_s4 = smov 512   ;;  %s3069_s26 = smov 32  }
  0xc4   : > { %2648 = dma.hbm_to_vmem [thread:$0]  (!%p3330_p7), %s3373_s24, 8192, %s3375_s0, %s3379_s3, %s3068_s4, %s3068_s4, %s3069_s26  }
  0xc5   : > { %p3848_p12 = scmp.ne.s32.totalorder %s3836_s23, 0 }
  0xc6   : > { %s3408_s10 = sand.u32 (!%p3848_p12), 1, %s3042_s14   ;;  %p3849_p6 = scmp.ne.s32.totalorder (!%p3848_p12), %s3833_s21, 0 }
  0xc7   : > { %434 = sbr.rel (%p3848_p12) target bundleno = 1177 (0x499), region = 56  ;;  %s3411_s11 = sshll.u32 (!%p3848_p12), %s3408_s10, 7 }
  0xc8   : > { %s437_s12 = scalar_lea.sflag (!%p3848_p12), [#allocation4], %s3408_s10  ;;  %s3415_s20 = scalar_lea.vmem (!%p3848_p12), [#allocation3], %s3411_s11 }
  0xce   : > { %3009 = dma.done.wait (%p3849_p6), %s437_s12, 2048  }
  0xcf   : > { %3011 = vsyncadd (%p3849_p6), %s437_s12, 4294965248  ;;  %s445_s0 = sand.u32 1, %s3160_s19   ;;  %s1982_s3 = sshll.u32 %s3408_s10, 9 }
  0xd0   : > { %s446_s23 = scalar_lea.sflag [#allocation7], %s445_s0  ;;  %s3423_s8 = scalar_lea.vmem [#allocation6], %s1982_s3 }
  0xd1   : > { %3013 = dma.done.wait (%p3849_p6), %s446_s23, 8192  }
  0xd2   : > { %3015 = vsyncadd (%p3849_p6), %s446_s23, 4294959104  ;;  %p3850_p7 = scmp.eq.s32.totalorder %s3160_s19, 0 }
  0xd4   : > { %3017 = dma.done.wait (%p3850_p7), [#allocation7], 8192   ;;  %p3851_p9 = pmov %p3850_p7 }
  0xd5   : > { %p3852_p0 = pmov %p3850_p7 }
  0xd6   : > { %3019 = vsyncadd (%p3851_p9), [#allocation7], 4294959104 }
  0xd7   : > { %3021 = dma.done.wait (%p3852_p0), [#allocation10], 4096   ;;  %p3853_p2 = pmov %p3852_p0 }
  0xd8   : > { %p3854_p13 = pmov %p3852_p0 }
  0xd9   : > { %3023 = vsyncadd (%p3853_p2), [#allocation10], 4294963200 }
  0xda   : > { %3025 = dma.done.wait (%p3854_p13), [#allocation13], 2048   ;;  %p3855_p4 = pmov %p3852_p0 }
  0xdb   : > { %v618_v0 = vld [vmem:[#allocation8 + $0x80] sm:$0xff]  ;;  %v619_v1 = vld [vmem:[#allocation8 + $0x88] sm:$0xff]  ;;  %v620_v11 = vld [vmem:[#allocation8 + $0x90] sm:$0xff]  ;;  %s3533_s24 = scalar_lea.vmem [#allocation14], %s3411_s11  ;;  %s3856_s29 = sld [smem:[#allocation31_spill]] }
  0xdc   : > { %3027 = vsyncadd (%p3855_p4), [#allocation13], 4294965248  ;;  %v650_v2 = vld [vmem:[#allocation8 + $0x180] sm:$0xff]  ;;  %v2429_v3 = vpack.c.bf16 %v619_v1, %v618_v0  ;;  %v651_v4 = vld [vmem:[#allocation8 + $0x188] sm:$0xff]  ;;  %s3857_s22 = sld [smem:[#allocation25_spill]]  ;;  %s3858_s12 = sld [smem:[#allocation32_spill]] }
  0xdd   : > { %v602_v5 = vld [vmem:[#allocation8] sm:$0xff]  ;;  %v603_v6 = vld [vmem:[#allocation8 + $0x8] sm:$0xff]  ;;  %v2461_v7 = vpack.c.bf16 %v651_v4, %v650_v2  ;;  %v621_v13 = vld [vmem:[#allocation8 + $0x98] sm:$0xff]  ;;  %s1770_s0 = sshll.u32 %s3533_s24, 4  ;;  %s1752_s3 = scalar_lea.sflag [#allocation5], %s3408_s10  ;;  %s3680_s0 = int_to_ptr.vmem [resolvable:$true] %s1770_s0 }
  0xde   : > { %v2431_v8 = vpack.c.bf16 %v603_v6, %v602_v5  ;;  %v634_v9 = vld [vmem:[#allocation8 + $0x100] sm:$0xff]  ;;  %v635_v10 = vld [vmem:[#allocation8 + $0x108] sm:$0xff]  ;;  %2430 = vmatprep.subr.bf16.mxu0 %v2429_v3  ;;  %v652_v14 = vld [vmem:[#allocation8 + $0x190] sm:$0xff]  ;;  %v2433_v16 = vpack.c.bf16 %v621_v13, %v620_v11  ;;  %s2928_s23 = scalar_lea.vmem %s3680_s0, 2048 }
  0xdf   : > { %v2463_v12 = vpack.c.bf16 %v635_v10, %v634_v9  ;;  %v653_v15 = vld [vmem:[#allocation8 + $0x198] sm:$0xff]  ;;  %2462 = vmatprep.subr.bf16.mxu1 %v2461_v7  ;;  %v604_v18 = vld [vmem:[#allocation8 + $0x10] sm:$0xff]  ;;  %v622_v23 = vld [vmem:[#allocation8 + $0xa0] sm:$0xff]  ;;  %p2929_p1 = scmp.ne.s32.totalorder %s3680_s0, %s2928_s23 }
  0xe0   : > { %2432 = vmatpush3.bf16.msra.mxu0 %v2431_v8  ;;  %v2465_v17 = vpack.c.bf16 %v653_v15, %v652_v14  ;;  %v605_v19 = vld [vmem:[#allocation8 + $0x18] sm:$0xff]  ;;  %v636_v20 = vld [vmem:[#allocation8 + $0x110] sm:$0xff]  ;;  %v623_v24 = vld [vmem:[#allocation8 + $0xa8] sm:$0xff] }
  0xe1   : > { %2464 = vmatpush3.bf16.msra.mxu1 %v2463_v12  ;;  %v2435_v21 = vpack.c.bf16 %v605_v19, %v604_v18  ;;  %v637_v22 = vld [vmem:[#allocation8 + $0x118] sm:$0xff]  ;;  %2434 = vmatprep.subr.bf16.mxu0 %v2433_v16  ;;  %v2437_v26 = vpack.c.bf16 %v623_v24, %v622_v23  ;;  %v654_v27 = vld [vmem:[#allocation8 + $0x1a0] sm:$0xff]  ;;  %v655_v28 = vld [vmem:[#allocation8 + $0x1a8] sm:$0xff]  ;;  %p2930_p8 = pnand %p2929_p1, %p3309_p5 }
  0xe2   : > { %2466 = vmatprep.subr.bf16.mxu1 %v2465_v17  ;;  %v2467_v25 = vpack.c.bf16 %v637_v22, %v636_v20  ;;  %v606_v29 = vld [vmem:[#allocation8 + $0x20] sm:$0xff]  ;;  %v2469_v30 = vpack.c.bf16 %v655_v28, %v654_v27  ;;  %v607_v31 = vld [vmem:[#allocation8 + $0x28] sm:$0xff]  ;;  %v624_v35 = vld [vmem:[#allocation8 + $0xb0] sm:$0xff]  ;;  %s2003_s30 = sshll.u32 %s3857_s22, 11 }
  0xe3   : > { %v638_v32 = vld [vmem:[#allocation8 + $0x120] sm:$0xff]  ;;  %v639_v33 = vld [vmem:[#allocation8 + $0x128] sm:$0xff]  ;;  %v2439_v34 = vpack.c.bf16 %v607_v31, %v606_v29  ;;  %v625_v36 = vld [vmem:[#allocation8 + $0xb8] sm:$0xff]  ;;  %p2931_p10 = pneg %p2930_p8 }
  0xe4   : > { %2436 = vmatpush3.bf16.msra.mxu0 %v2435_v21  ;;  %v656_v37 = vld [vmem:[#allocation8 + $0x1b0] sm:$0xff]  ;;  %v2471_v38 = vpack.c.bf16 %v639_v33, %v638_v32  ;;  %v2441_v39 = vpack.c.bf16 %v625_v36, %v624_v35  ;;  %v657_v40 = vld [vmem:[#allocation8 + $0x1b8] sm:$0xff]  ;;  %v626_v46 = vld [vmem:[#allocation8 + $0xc0] sm:$0xff] }
  0xe5   : > { %2468 = vmatpush3.bf16.msra.mxu1 %v2467_v25  ;;  %2438 = vmatprep.subr.bf16.mxu0 %v2437_v26  ;;  %v608_v41 = vld [vmem:[#allocation8 + $0x30] sm:$0xff]  ;;  %v609_v42 = vld [vmem:[#allocation8 + $0x38] sm:$0xff]  ;;  %v2473_v43 = vpack.c.bf16 %v657_v40, %v656_v37  ;;  %v627_v47 = vld [vmem:[#allocation8 + $0xc8] sm:$0xff] }
  0xe6   : > { %2470 = vmatprep.subr.bf16.mxu1 %v2469_v30  ;;  %v640_v44 = vld [vmem:[#allocation8 + $0x130] sm:$0xff]  ;;  %v641_v45 = vld [vmem:[#allocation8 + $0x138] sm:$0xff]  ;;  %v658_v48 = vld [vmem:[#allocation8 + $0x1c0] sm:$0xff]  ;;  %v2443_v50 = vpack.c.bf16 %v609_v42, %v608_v41  ;;  %v2445_v52 = vpack.c.bf16 %v627_v47, %v626_v46 }
  0xe7   : > { %v659_v49 = vld [vmem:[#allocation8 + $0x1c8] sm:$0xff]  ;;  %v2475_v51 = vpack.c.bf16 %v641_v45, %v640_v44  ;;  %v610_v53 = vld [vmem:[#allocation8 + $0x40] sm:$0xff]  ;;  %v628_v58 = vld [vmem:[#allocation8 + $0xd0] sm:$0xff] }
  0xe8   : > { %2440 = vmatpush3.bf16.msra.mxu0 %v2439_v34  ;;  %v611_v54 = vld [vmem:[#allocation8 + $0x48] sm:$0xff]  ;;  %v642_v55 = vld [vmem:[#allocation8 + $0x140] sm:$0xff]  ;;  %v2477_v56 = vpack.c.bf16 %v659_v49, %v658_v48  ;;  %v629_v59 = vld [vmem:[#allocation8 + $0xd8] sm:$0xff] }
  0xe9   : > { %2472 = vmatpush3.bf16.msra.mxu1 %v2471_v38  ;;  %2442 = vmatprep.subr.bf16.mxu0 %v2441_v39  ;;  %v643_v57 = vld [vmem:[#allocation8 + $0x148] sm:$0xff]  ;;  %v660_v60 = vld [vmem:[#allocation8 + $0x1d0] sm:$0xff]  ;;  %v661_v61 = vld [vmem:[#allocation8 + $0x1d8] sm:$0xff]  ;;  %v2447_v62 = vpack.c.bf16 %v611_v54, %v610_v53  ;;  %v2449_v0 = vpack.c.bf16 %v629_v59, %v628_v58 }
  0xea   : > { %2474 = vmatprep.subr.bf16.mxu1 %v2473_v43  ;;  %v2479_v63 = vpack.c.bf16 %v643_v57, %v642_v55  ;;  %v612_v1 = vld [vmem:[#allocation8 + $0x50] sm:$0xff]  ;;  %v613_v2 = vld [vmem:[#allocation8 + $0x58] sm:$0xff]  ;;  %v2481_v4 = vpack.c.bf16 %v661_v61, %v660_v60  ;;  %v630_v6 = vld [vmem:[#allocation8 + $0xe0] sm:$0xff] }
  0xeb   : > { %v644_v3 = vld [vmem:[#allocation8 + $0x150] sm:$0xff]  ;;  %v645_v5 = vld [vmem:[#allocation8 + $0x158] sm:$0xff]  ;;  %v631_v7 = vld [vmem:[#allocation8 + $0xe8] sm:$0xff]  ;;  %v2451_v10 = vpack.c.bf16 %v613_v2, %v612_v1 }
  0xec   : > { %2444 = vmatpush3.bf16.msra.mxu0 %v2443_v50  ;;  %v662_v8 = vld [vmem:[#allocation8 + $0x1e0] sm:$0xff]  ;;  %v663_v9 = vld [vmem:[#allocation8 + $0x1e8] sm:$0xff]  ;;  %v2483_v13 = vpack.c.bf16 %v645_v5, %v644_v3  ;;  %v2453_v14 = vpack.c.bf16 %v631_v7, %v630_v6  ;;  %v541_v17 = vld [vmem:[%s3423_s8 + $0x18] sm:$0xff] }
  0xed   : > { %2476 = vmatpush3.bf16.msra.mxu1 %v2475_v51  ;;  %2446 = vmatprep.subr.bf16.mxu0 %v2445_v52  ;;  %v614_v11 = vld [vmem:[#allocation8 + $0x60] sm:$0xff]  ;;  %v615_v12 = vld [vmem:[#allocation8 + $0x68] sm:$0xff]  ;;  %v2485_v18 = vpack.c.bf16 %v663_v9, %v662_v8  ;;  %v632_v20 = vld [vmem:[#allocation8 + $0xf0] sm:$0xff] }
  0xee   : > { %2478 = vmatprep.subr.bf16.mxu1 %v2477_v56  ;;  %v646_v15 = vld [vmem:[#allocation8 + $0x160] sm:$0xff]  ;;  %v539_v16 = vld [vmem:[%s3423_s8 + $0x8] sm:$0xff]  ;;  %v633_v21 = vld [vmem:[#allocation8 + $0xf8] sm:$0xff]  ;;  %891 = vmatprep.mubr.f32.mxu1 %v541_v17  ;;  %v2455_v24 = vpack.c.bf16 %v615_v12, %v614_v11 }
  0xef   : > { %v647_v19 = vld [vmem:[#allocation8 + $0x168] sm:$0xff]  ;;  %746 = vmatprep.mubr.f32.mxu0 %v539_v16  ;;  %v664_v22 = vld [vmem:[#allocation8 + $0x1f0] sm:$0xff]  ;;  %v665_v23 = vld [vmem:[#allocation8 + $0x1f8] sm:$0xff]  ;;  %v2457_v26 = vpack.c.bf16 %v633_v21, %v632_v20 }
  0xf0   : > { %2448 = vmatpush3.bf16.msra.mxu0 %v2447_v62  ;;  %v2487_v25 = vpack.c.bf16 %v647_v19, %v646_v15  ;;  %v616_v27 = vld [vmem:[#allocation8 + $0x70] sm:$0xff]  ;;  %v617_v28 = vld [vmem:[#allocation8 + $0x78] sm:$0xff]  ;;  %v2489_v29 = vpack.c.bf16 %v665_v23, %v664_v22  ;;  %v538_v34 = vld [vmem:[%s3423_s8] sm:$0xff] }
  0xf1   : > { %2480 = vmatpush3.bf16.msra.mxu1 %v2479_v63  ;;  %2450 = vmatprep.subr.bf16.mxu0 %v2449_v0  ;;  %v648_v30 = vld [vmem:[#allocation8 + $0x170] sm:$0xff]  ;;  %v649_v31 = vld [vmem:[#allocation8 + $0x178] sm:$0xff]  ;;  %v2459_v32 = vpack.c.bf16 %v617_v28, %v616_v27  ;;  %v543_v36 = vld [vmem:[%s3423_s8 + $0x28] sm:$0xff] }
  0xf2   : > { %2482 = vmatprep.subr.bf16.mxu1 %v2481_v4  ;;  %v2491_v33 = vpack.c.bf16 %v649_v31, %v648_v30  ;;  %v540_v35 = vld [vmem:[%s3423_s8 + $0x10] sm:$0xff]  ;;  %v545_v37 = vld [vmem:[%s3423_s8 + $0x38] sm:$0xff]  ;;  %v542_v38 = vld [vmem:[%s3423_s8 + $0x20] sm:$0xff] }
  0xf3   : > { %v544_v39 = vld [vmem:[%s3423_s8 + $0x30] sm:$0xff]  ;;  %v547_v40 = vld [vmem:[%s3423_s8 + $0x48] sm:$0xff]  ;;  %v549_v41 = vld [vmem:[%s3423_s8 + $0x58] sm:$0xff] }
  0xf4   : > { %2452 = vmatpush3.bf16.msra.mxu0 %v2451_v10  ;;  %v546_v42 = vld [vmem:[%s3423_s8 + $0x40] sm:$0xff]  ;;  %v548_v43 = vld [vmem:[%s3423_s8 + $0x50] sm:$0xff]  ;;  %v551_v44 = vld [vmem:[%s3423_s8 + $0x68] sm:$0xff] }
  0xf5   : > { %2484 = vmatpush3.bf16.msra.mxu1 %v2483_v13  ;;  %2454 = vmatprep.subr.bf16.mxu0 %v2453_v14  ;;  %v553_v45 = vld [vmem:[%s3423_s8 + $0x78] sm:$0xff]  ;;  %v1055_v46 = vld [vmem:[#allocation11] sm:$0xff]  ;;  %v1056_v47 = vld [vmem:[#allocation11 + $0x8] sm:$0xff] }
  0xf6   : > { %2486 = vmatprep.subr.bf16.mxu1 %v2485_v18  ;;  %v1057_v48 = vld [vmem:[#allocation11 + $0x10] sm:$0xff]  ;;  %v1058_v49 = vld [vmem:[#allocation11 + $0x18] sm:$0xff]  ;;  %v550_v50 = vld [vmem:[%s3423_s8 + $0x60] sm:$0xff]  ;;  %v2493_v51 = vpack.c.bf16 %v1056_v47, %v1055_v46 }
  0xf7   : > { %v552_v52 = vld [vmem:[%s3423_s8 + $0x70] sm:$0xff]  ;;  %v555_v53 = vld [vmem:[%s3423_s8 + $0x88] sm:$0xff]  ;;  %v557_v54 = vld [vmem:[%s3423_s8 + $0x98] sm:$0xff]  ;;  %v2497_v55 = vpack.c.bf16 %v1058_v49, %v1057_v48 }
  0xf8   : > { %2456 = vmatpush3.bf16.msra.mxu0 %v2455_v24  ;;  %v1059_v56 = vld [vmem:[#allocation11 + $0x20] sm:$0xff]  ;;  %v1060_v57 = vld [vmem:[#allocation11 + $0x28] sm:$0xff]  ;;  %v556_v59 = vld [vmem:[%s3423_s8 + $0x90] sm:$0xff] }
  0xf9   : > { %2488 = vmatpush3.bf16.msra.mxu1 %v2487_v25  ;;  %2458 = vmatprep.subr.bf16.mxu0 %v2457_v26  ;;  %v554_v58 = vld [vmem:[%s3423_s8 + $0x80] sm:$0xff]  ;;  %v559_v60 = vld [vmem:[%s3423_s8 + $0xa8] sm:$0xff]  ;;  %v561_v61 = vld [vmem:[%s3423_s8 + $0xb8] sm:$0xff]  ;;  %v2501_v62 = vpack.c.bf16 %v1060_v57, %v1059_v56 }
  0xfa   : > { %2490 = vmatprep.subr.bf16.mxu1 %v2489_v29  ;;  %v1061_v63 = vld [vmem:[#allocation11 + $0x30] sm:$0xff]  ;;  %v1062_v0 = vld [vmem:[#allocation11 + $0x38] sm:$0xff]  ;;  %v558_v1 = vld [vmem:[%s3423_s8 + $0xa0] sm:$0xff] }
  0xfb   : > { %v560_v2 = vld [vmem:[%s3423_s8 + $0xb0] sm:$0xff]  ;;  %v563_v3 = vld [vmem:[%s3423_s8 + $0xc8] sm:$0xff]  ;;  %v565_v4 = vld [vmem:[%s3423_s8 + $0xd8] sm:$0xff]  ;;  %v2505_v5 = vpack.c.bf16 %v1062_v0, %v1061_v63 }
  0xfc   : > { %2460 = vmatpush3.bf16.msra.mxu0 %v2459_v32  ;;  %v1063_v6 = vld [vmem:[#allocation11 + $0x40] sm:$0xff]  ;;  %v1064_v7 = vld [vmem:[#allocation11 + $0x48] sm:$0xff]  ;;  %v564_v9 = vld [vmem:[%s3423_s8 + $0xd0] sm:$0xff] }
  0xfd   : > { %2492 = vmatpush3.bf16.msra.mxu1 %v2491_v33  ;;  %2494 = vmatprep.subr.bf16.mxu0 %v2493_v51  ;;  %v562_v8 = vld [vmem:[%s3423_s8 + $0xc0] sm:$0xff]  ;;  %v567_v10 = vld [vmem:[%s3423_s8 + $0xe8] sm:$0xff]  ;;  %v569_v11 = vld [vmem:[%s3423_s8 + $0xf8] sm:$0xff]  ;;  %v2509_v12 = vpack.c.bf16 %v1064_v7, %v1063_v6 }
  0xfe   : > { %v1065_v13 = vld [vmem:[#allocation11 + $0x50] sm:$0xff]  ;;  %v1066_v14 = vld [vmem:[#allocation11 + $0x58] sm:$0xff]  ;;  %v566_v15 = vld [vmem:[%s3423_s8 + $0xe0] sm:$0xff] }
  0xff   : > { %747 = vmatmul.mubr.f32.vlgmr.msra.gmra.mrb[0].mxu0 %v538_v34  ;;  %v568_v16 = vld [vmem:[%s3423_s8 + $0xf0] sm:$0xff]  ;;  %v571_v17 = vld [vmem:[%s3423_s8 + $0x108] sm:$0xff]  ;;  %v573_v18 = vld [vmem:[%s3423_s8 + $0x118] sm:$0xff]  ;;  %v2513_v19 = vpack.c.bf16 %v1066_v14, %v1065_v13 }
 0x100   : > { %892 = vmatmul.mubr.f32.vlgmr.msra.gmra.mrb[0].mxu1 %v540_v35  ;;  %751 = vmatprep.mubr.f32.mxu0 %v543_v36  ;;  %v570_v20 = vld [vmem:[%s3423_s8 + $0x100] sm:$0xff]  ;;  %v572_v21 = vld [vmem:[%s3423_s8 + $0x110] sm:$0xff]  ;;  %v575_v22 = vld [vmem:[%s3423_s8 + $0x128] sm:$0xff] }
 0x101   : > { %896 = vmatprep.mubr.f32.mxu1 %v545_v37  ;;  %2496 = vmatpush3.bf16.msra.mxu0 %v2493_v51  ;;  %v577_v23 = vld [vmem:[%s3423_s8 + $0x138] sm:$0xff]  ;;  %v574_v24 = vld [vmem:[%s3423_s8 + $0x120] sm:$0xff]  ;;  %v576_v25 = vld [vmem:[%s3423_s8 + $0x130] sm:$0xff] }
 0x102   : > { %2498 = vmatprep.subr.bf16.mxu0 %v2497_v55  ;;  %v579_v26 = vld [vmem:[%s3423_s8 + $0x148] sm:$0xff]  ;;  %v581_v27 = vld [vmem:[%s3423_s8 + $0x158] sm:$0xff]  ;;  %v578_v28 = vld [vmem:[%s3423_s8 + $0x140] sm:$0xff] }
 0x103   : > { %752 = vmatmul.mubr.f32.gmra.mrb[2].mxu0 %v542_v38  ;;  %v580_v29 = vld [vmem:[%s3423_s8 + $0x150] sm:$0xff]  ;;  %v583_v30 = vld [vmem:[%s3423_s8 + $0x168] sm:$0xff]  ;;  %v585_v31 = vld [vmem:[%s3423_s8 + $0x178] sm:$0xff] }
 0x104   : > { %897 = vmatmul.mubr.f32.gmra.mrb[2].mxu1 %v544_v39  ;;  %756 = vmatprep.mubr.f32.mxu0 %v547_v40  ;;  %v582_v32 = vld [vmem:[%s3423_s8 + $0x160] sm:$0xff]  ;;  %v584_v33 = vld [vmem:[%s3423_s8 + $0x170] sm:$0xff]  ;;  %v587_v34 = vld [vmem:[%s3423_s8 + $0x188] sm:$0xff] }
 0x105   : > { %901 = vmatprep.mubr.f32.mxu1 %v549_v41  ;;  %2500 = vmatpush3.bf16.msra.mxu0 %v2497_v55  ;;  %v589_v35 = vld [vmem:[%s3423_s8 + $0x198] sm:$0xff]  ;;  %v586_v36 = vld [vmem:[%s3423_s8 + $0x180] sm:$0xff]  ;;  %v588_v37 = vld [vmem:[%s3423_s8 + $0x190] sm:$0xff] }
 0x106   : > { %2502 = vmatprep.subr.bf16.mxu0 %v2501_v62  ;;  %v591_v38 = vld [vmem:[%s3423_s8 + $0x1a8] sm:$0xff]  ;;  %v593_v39 = vld [vmem:[%s3423_s8 + $0x1b8] sm:$0xff]  ;;  %v590_v40 = vld [vmem:[%s3423_s8 + $0x1a0] sm:$0xff] }
 0x107   : > { %757 = vmatmul.mubr.f32.gmra.mrb[4].mxu0 %v546_v42  ;;  %v592_v41 = vld [vmem:[%s3423_s8 + $0x1b0] sm:$0xff]  ;;  %v595_v42 = vld [vmem:[%s3423_s8 + $0x1c8] sm:$0xff]  ;;  %v601_v47 = vld [vmem:[%s3423_s8 + $0x1f8] sm:$0xff] }
 0x108   : > { %902 = vmatmul.mubr.f32.gmra.mrb[4].mxu1 %v548_v43  ;;  %761 = vmatprep.mubr.f32.mxu0 %v551_v44  ;;  %v597_v43 = vld [vmem:[%s3423_s8 + $0x1d8] sm:$0xff]  ;;  %v594_v44 = vld [vmem:[%s3423_s8 + $0x1c0] sm:$0xff]  ;;  %v599_v46 = vld [vmem:[%s3423_s8 + $0x1e8] sm:$0xff] }
 0x109   : > { %906 = vmatprep.mubr.f32.mxu1 %v553_v45  ;;  %2504 = vmatpush3.bf16.msra.mxu0 %v2501_v62  ;;  %v596_v45 = vld [vmem:[%s3423_s8 + $0x1d0] sm:$0xff]  ;;  %v598_v48 = vld [vmem:[%s3423_s8 + $0x1e0] sm:$0xff]  ;;  %v1068_v51 = vld [vmem:[#allocation11 + $0x68] sm:$0xff] }
 0x10a   : > { %2506 = vmatprep.subr.bf16.mxu0 %v2505_v5  ;;  %v600_v49 = vld [vmem:[%s3423_s8 + $0x1f0] sm:$0xff]  ;;  %v1023_v56 = vld [vmem:[#allocation9] sm:$0xff]  ;;  %v1024_v57 = vld [vmem:[#allocation9 + $0x8] sm:$0xff]  ;;  %s3070_s8 = smov [#allocation14]  }
 0x10b   : > { %762 = vmatmul.mubr.f32.gmra.mrb[6].mxu0 %v550_v50  ;;  %v1067_v50 = vld [vmem:[#allocation11 + $0x60] sm:$0xff]  ;;  %v1419_v63 = vld [vmem:[#allocation12 + $0x18] sm:$0xff]  ;;  %v1429_v14 = vld [vmem:[#allocation12 + $0x68] sm:$0xff]  ;;  %s2932_s19 = sshll.u32 %s3070_s8, 4  ;;  %s2933_s19 = int_to_ptr.vmem [resolvable:$false] %s2932_s19 }
 0x10c   : > { %907 = vmatmul.mubr.f32.gmra.mrb[6].mxu1 %v552_v52  ;;  %766 = vmatprep.mubr.f32.mxu0 %v555_v53  ;;  %v2517_v52 = vpack.c.bf16 %v1068_v51, %v1067_v50  ;;  %v1069_v53 = vld [vmem:[#allocation11 + $0x70] sm:$0xff]  ;;  %v1424_v7 = vld [vmem:[#allocation12 + $0x40] sm:$0xff]  ;;  %s2934_s21 = scalar_lea.vmem %s2933_s19, 4096  ;;  %p2935_p3 = scmp.lt.s32.totalorder %s3680_s0, %s2933_s19 }
 0x10d   : > { %911 = vmatprep.mubr.f32.mxu1 %v557_v54  ;;  %2508 = vmatpush3.bf16.msra.mxu0 %v2505_v5  ;;  %v1070_v54 = vld [vmem:[#allocation11 + $0x78] sm:$0xff]  ;;  %v1428_v13 = vld [vmem:[#allocation12 + $0x60] sm:$0xff]  ;;  %v1029_v51 = vld [vmem:[#allocation9 + $0x30] sm:$0xff]  ;;  %p2936_p11 = scmp.lt.s32.totalorder %s2934_s21, %s2928_s23 }
 0x10e   : > { %2510 = vmatprep.subr.bf16.mxu0 %v2509_v12  ;;  %v2521_v55 = vpack.c.bf16 %v1070_v54, %v1069_v53  ;;  %v1423_v5 = vld [vmem:[#allocation12 + $0x38] sm:$0xff] }
 0x10f   : > { %767 = vmatmul.mubr.f32.gmra.mrb[8].mxu0 %v554_v58  ;;  %v3505_v58 = vpack.c.bf16 %v1024_v57, %v1023_v56  ;;  %p2937_p12 = por %p2936_p11, %p2935_p3 }
 0x110   : > { %912 = vmatmul.mubr.f32.gmra.mrb[8].mxu1 %v556_v59  ;;  %771 = vmatprep.mubr.f32.mxu0 %v559_v60  ;;  %v1416_v59 = vld [vmem:[#allocation12] sm:$0xff]  ;;  %v1417_v60 = vld [vmem:[#allocation12 + $0x8] sm:$0xff] }
 0x111   : > { %916 = vmatprep.mubr.f32.mxu1 %v561_v61  ;;  %2512 = vmatpush3.bf16.msra.mxu0 %v2509_v12  ;;  %v1418_v61 = vld [vmem:[#allocation12 + $0x10] sm:$0xff]  ;;  %v2557_v62 = vpack.c.bf16 %v1417_v60, %v1416_v59  ;;  %p2938_p6 = pnand %p2937_p12, %p2931_p10 }
 0x112   : > { %2514 = vmatprep.subr.bf16.mxu0 %v2513_v19  ;;  %v2561_v0 = vpack.c.bf16 %v1419_v63, %v1418_v61  ;;  %v1031_v61 = vld [vmem:[#allocation9 + $0x40] sm:$0xff] }
 0x113   : > { %772 = vmatmul.mubr.f32.gmra.mrb[10].mxu0 %v558_v1  ;;  %v1420_v1 = vld [vmem:[#allocation12 + $0x20] sm:$0xff]  ;;  %2558 = vmatprep.subr.bf16.mxu1 %v2557_v62 }
 0x114   : > { %917 = vmatmul.mubr.f32.gmra.mrb[10].mxu1 %v560_v2  ;;  %776 = vmatprep.mubr.f32.mxu0 %v563_v3  ;;  %v1421_v2 = vld [vmem:[#allocation12 + $0x28] sm:$0xff] }
 0x115   : > { %921 = vmatprep.mubr.f32.mxu1 %v565_v4  ;;  %2516 = vmatpush3.bf16.msra.mxu0 %v2513_v19  ;;  %v2565_v3 = vpack.c.bf16 %v1421_v2, %v1420_v1  ;;  %v1422_v4 = vld [vmem:[#allocation12 + $0x30] sm:$0xff] }
 0x116   : > { %2518 = vmatprep.subr.bf16.mxu0 %v2517_v52  ;;  %2560 = vmatpush3.bf16.msra.mxu1 %v2557_v62  ;;  %v2569_v6 = vpack.c.bf16 %v1423_v5, %v1422_v4  ;;  %v1032_v62 = vld [vmem:[#allocation9 + $0x48] sm:$0xff] }
 0x117   : > { %777 = vmatmul.mubr.f32.gmra.mrb[12].mxu0 %v562_v8  ;;  %2562 = vmatprep.subr.bf16.mxu1 %v2561_v0  ;;  %v1425_v8 = vld [vmem:[#allocation12 + $0x48] sm:$0xff]  ;;  %v2541_v4 = vpack.c.bf16 %v1032_v62, %v1031_v61 }
 0x118   : > { %922 = vmatmul.mubr.f32.gmra.mrb[12].mxu1 %v564_v9  ;;  %781 = vmatprep.mubr.f32.mxu0 %v567_v10  ;;  %v2573_v9 = vpack.c.bf16 %v1425_v8, %v1424_v7  ;;  %v1426_v10 = vld [vmem:[#allocation12 + $0x50] sm:$0xff]  ;;  %v1034_v8 = vld [vmem:[#allocation9 + $0x58] sm:$0xff] }
 0x119   : > { %926 = vmatprep.mubr.f32.mxu1 %v569_v11  ;;  %2520 = vmatpush3.bf16.msra.mxu0 %v2517_v52  ;;  %v1427_v11 = vld [vmem:[#allocation12 + $0x58] sm:$0xff]  ;;  %v1033_v7 = vld [vmem:[#allocation9 + $0x50] sm:$0xff] }
 0x11a   : > { %2522 = vmatprep.subr.bf16.mxu0 %v2521_v55  ;;  %2564 = vmatpush3.bf16.msra.mxu1 %v2561_v0  ;;  %v2577_v12 = vpack.c.bf16 %v1427_v11, %v1426_v10  ;;  %v1030_v52 = vld [vmem:[#allocation9 + $0x38] sm:$0xff] }
 0x11b   : > { %782 = vmatmul.mubr.f32.gmra.mrb[14].mxu0 %v566_v15  ;;  %2566 = vmatprep.subr.bf16.mxu1 %v2565_v3  ;;  %v2581_v15 = vpack.c.bf16 %v1429_v14, %v1428_v13  ;;  %v2537_v59 = vpack.c.bf16 %v1030_v52, %v1029_v51  ;;  %v2545_v14 = vpack.c.bf16 %v1034_v8, %v1033_v7 }
 0x11c   : > { %927 = vmatmul.mubr.f32.gmra.mrb[14].mxu1 %v568_v16  ;;  %786 = vmatprep.mubr.f32.mxu0 %v571_v17  ;;  %v1430_v16 = vld [vmem:[#allocation12 + $0x70] sm:$0xff]  ;;  %v1431_v17 = vld [vmem:[#allocation12 + $0x78] sm:$0xff] }
 0x11d   : > { %931 = vmatprep.mubr.f32.mxu1 %v573_v18  ;;  %2524 = vmatpush3.bf16.msra.mxu0 %v2521_v55  ;;  %v2585_v18 = vpack.c.bf16 %v1431_v17, %v1430_v16  ;;  %v1035_v17 = vld [vmem:[#allocation9 + $0x60] sm:$0xff] }
 0x11e   : > { %2526 = vmatprep.subr.bf16.mxu0 %v3505_v58  ;;  %2568 = vmatpush3.bf16.msra.mxu1 %v2565_v3 }
 0x11f   : > { %787 = vmatmul.mubr.f32.gmra.mrb[16].mxu0 %v570_v20  ;;  %2570 = vmatprep.subr.bf16.mxu1 %v2569_v6 }
 0x120   : > { %932 = vmatmul.mubr.f32.gmra.mrb[16].mxu1 %v572_v21  ;;  %791 = vmatprep.mubr.f32.mxu0 %v575_v22 }
 0x121   : > { %936 = vmatprep.mubr.f32.mxu1 %v577_v23 }
 0x122   : > { %2572 = vmatpush3.bf16.msra.mxu1 %v2569_v6 }
 0x123   : > { %792 = vmatmul.mubr.f32.gmra.mrb[18].mxu0 %v574_v24  ;;  %2574 = vmatprep.subr.bf16.mxu1 %v2573_v9 }
 0x124   : > { %937 = vmatmul.mubr.f32.gmra.mrb[18].mxu1 %v576_v25  ;;  %796 = vmatprep.mubr.f32.mxu0 %v579_v26 }
 0x125   : > { %941 = vmatprep.mubr.f32.mxu1 %v581_v27 }
 0x126   : > { %2576 = vmatpush3.bf16.msra.mxu1 %v2573_v9 }
 0x127   : > { %797 = vmatmul.mubr.f32.gmra.mrb[20].mxu0 %v578_v28  ;;  %2578 = vmatprep.subr.bf16.mxu1 %v2577_v12 }
 0x128   : > { %942 = vmatmul.mubr.f32.gmra.mrb[20].mxu1 %v580_v29  ;;  %801 = vmatprep.mubr.f32.mxu0 %v583_v30 }
 0x129   : > { %946 = vmatprep.mubr.f32.mxu1 %v585_v31  ;;  %v1025_v31 = vld [vmem:[#allocation9 + $0x10] sm:$0xff] }
 0x12a   : > { %2580 = vmatpush3.bf16.msra.mxu1 %v2577_v12 }
 0x12b   : > { %802 = vmatmul.mubr.f32.gmra.mrb[22].mxu0 %v582_v32  ;;  %2582 = vmatprep.subr.bf16.mxu1 %v2581_v15  ;;  %v1026_v32 = vld [vmem:[#allocation9 + $0x18] sm:$0xff] }
 0x12c   : > { %947 = vmatmul.mubr.f32.gmra.mrb[22].mxu1 %v584_v33  ;;  %806 = vmatprep.mubr.f32.mxu0 %v587_v34 }
 0x12d   : > { %951 = vmatprep.mubr.f32.mxu1 %v589_v35 }
 0x12e   : > { %2584 = vmatpush3.bf16.msra.mxu1 %v2581_v15 }
 0x12f   : > { %807 = vmatmul.mubr.f32.gmra.mrb[24].mxu0 %v586_v36  ;;  %2586 = vmatprep.subr.bf16.mxu1 %v2585_v18 }
 0x130   : > { %952 = vmatmul.mubr.f32.gmra.mrb[24].mxu1 %v588_v37  ;;  %811 = vmatprep.mubr.f32.mxu0 %v591_v38  ;;  %v2529_v38 = vpack.c.bf16 %v1026_v32, %v1025_v31 }
 0x131   : > { %956 = vmatprep.mubr.f32.mxu1 %v593_v39 }
 0x132   : > { %2588 = vmatpush3.bf16.msra.mxu1 %v2585_v18  ;;  %v1036_v18 = vld [vmem:[#allocation9 + $0x68] sm:$0xff] }
 0x133   : > { %812 = vmatmul.mubr.f32.gmra.mrb[26].mxu0 %v590_v40 }
 0x134   : > { %957 = vmatmul.mubr.f32.gmra.mrb[26].mxu1 %v592_v41  ;;  %816 = vmatprep.mubr.f32.mxu0 %v595_v42  ;;  %v1027_v41 = vld [vmem:[#allocation9 + $0x20] sm:$0xff]  ;;  %v1028_v42 = vld [vmem:[#allocation9 + $0x28] sm:$0xff] }
 0x135   : > { %961 = vmatprep.mubr.f32.mxu1 %v597_v43 }
 0x137   : > { %817 = vmatmul.mubr.f32.gmra.mrb[28].mxu0 %v594_v44 }
 0x138   : > { %962 = vmatmul.mubr.f32.gmra.mrb[28].mxu1 %v596_v45  ;;  %821 = vmatprep.mubr.f32.mxu0 %v599_v46 }
 0x139   : > { %966 = vmatprep.mubr.f32.mxu1 %v601_v47 }
 0x13b   : > { %822 = vmatmul.mubr.f32.gmra.mrb[30].mxu0 %v598_v48  ;;  %v2533_v48 = vpack.c.bf16 %v1028_v42, %v1027_v41 }
 0x13c   : > { %967 = vmatmul.mubr.f32.gmra.mrb[30].mxu1 %v600_v49 }
 0x1d2   : > { %v2037_v19 = vpop.f32.mrb[0].mxu0 }
 0x1d3   : > { %v2117_v20 = vpop.f32.mrb[0].mxu1  ;;  %v2038_v21 = vpop.f32.mrb[1].mxu0 }
 0x1d4   : > { %v2039_v22 = vadd.f32 %v2038_v21, %v2037_v19  ;;  %v2118_v23 = vpop.f32.mrb[1].mxu1 }
 0x1d5   : > { %v2119_v24 = vadd.f32 %v2118_v23, %v2117_v20 }
 0x1d6   : > { %v2040_v25 = vpop.f32.mrb[2].mxu0 }
 0x1d7   : > { %v894_v26 = vadd.f32 %v2119_v24, %v2039_v22  ;;  %v2120_v27 = vpop.f32.mrb[2].mxu1  ;;  %v2041_v28 = vpop.f32.mrb[3].mxu0  ;;  %v2549_v24 = vpack.c.bf16 %v1036_v18, %v1035_v17 }
 0x1d8   : > { %v2042_v29 = vadd.f32 %v2041_v28, %v2040_v25  ;;  %v2121_v30 = vpop.f32.mrb[3].mxu1  ;;  %v1038_v28 = vld [vmem:[#allocation9 + $0x78] sm:$0xff] }
 0x1d9   : > { %v2122_v33 = vadd.f32 %v2121_v30, %v2120_v27  ;;  %2293 = vmatprep.mubr.f32.mxu0 %v894_v26  ;;  %v1037_v27 = vld [vmem:[#allocation9 + $0x70] sm:$0xff] }
 0x1da   : > { %v2043_v34 = vpop.f32.mrb[4].mxu0 }
 0x1db   : > { %v899_v35 = vadd.f32 %v2122_v33, %v2042_v29  ;;  %v2123_v36 = vpop.f32.mrb[4].mxu1  ;;  %v2044_v37 = vpop.f32.mrb[5].mxu0 }
 0x1dc   : > { %v2045_v39 = vadd.f32 %v2044_v37, %v2043_v34  ;;  %v2124_v40 = vpop.f32.mrb[5].mxu1  ;;  %v2553_v34 = vpack.c.bf16 %v1038_v28, %v1037_v27  ;;  %v1010_v27 = vld [vmem:[%s3415_s20 + $0x18] sm:$0xff]  ;;  %v1011_v28 = vld [vmem:[%s3415_s20 + $0x20] sm:$0xff] }
 0x1dd   : > { %v2125_v43 = vadd.f32 %v2124_v40, %v2123_v36  ;;  %2294 = vmatmul.mubr.f32.vlgmr.msra.gmra.mrb[32].mxu0 %v899_v35 }
 0x1de   : > { %v2046_v44 = vpop.f32.mrb[6].mxu0  ;;  %2528 = vmatpush3.bf16.msra.mxu0 %v3505_v58 }
 0x1df   : > { %v904_v45 = vadd.f32 %v2125_v43, %v2045_v39  ;;  %v2126_v46 = vpop.f32.mrb[6].mxu1  ;;  %v2047_v47 = vpop.f32.mrb[7].mxu0  ;;  %2530 = vmatprep.subr.bf16.mxu0 %v2529_v38 }
 0x1e0   : > { %v2048_v49 = vadd.f32 %v2047_v47, %v2046_v44  ;;  %v2127_v50 = vpop.f32.mrb[7].mxu1 }
 0x1e1   : > { %v2128_v53 = vadd.f32 %v2127_v50, %v2126_v46  ;;  %2296 = vmatprep.mubr.f32.mxu0 %v904_v45 }
 0x1e2   : > { %v2049_v54 = vpop.f32.mrb[8].mxu0  ;;  %2532 = vmatpush3.bf16.msra.mxu0 %v2529_v38 }
 0x1e3   : > { %v909_v55 = vadd.f32 %v2128_v53, %v2048_v49  ;;  %v2129_v56 = vpop.f32.mrb[8].mxu1  ;;  %v2050_v57 = vpop.f32.mrb[9].mxu0  ;;  %2534 = vmatprep.subr.bf16.mxu0 %v2533_v48 }
 0x1e4   : > { %v2051_v60 = vadd.f32 %v2050_v57, %v2049_v54  ;;  %v2130_v58 = vpop.f32.mrb[9].mxu1 }
 0x1e5   : > { %v2131_v63 = vadd.f32 %v2130_v58, %v2129_v56  ;;  %2297 = vmatmul.mubr.f32.gmra.mrb[34].mxu0 %v909_v55 }
 0x1e6   : > { %v2052_v0 = vpop.f32.mrb[10].mxu0  ;;  %2536 = vmatpush3.bf16.msra.mxu0 %v2533_v48 }
 0x1e7   : > { %v914_v1 = vadd.f32 %v2131_v63, %v2051_v60  ;;  %v2132_v2 = vpop.f32.mrb[10].mxu1  ;;  %v2053_v3 = vpop.f32.mrb[11].mxu0  ;;  %2538 = vmatprep.subr.bf16.mxu0 %v2537_v59 }
 0x1e8   : > { %v2054_v5 = vadd.f32 %v2053_v3, %v2052_v0  ;;  %v2133_v6 = vpop.f32.mrb[11].mxu1 }
 0x1e9   : > { %v2134_v9 = vadd.f32 %v2133_v6, %v2132_v2  ;;  %2299 = vmatprep.mubr.f32.mxu0 %v914_v1 }
 0x1ea   : > { %v2055_v10 = vpop.f32.mrb[12].mxu0  ;;  %2540 = vmatpush3.bf16.msra.mxu0 %v2537_v59 }
 0x1eb   : > { %v919_v11 = vadd.f32 %v2134_v9, %v2054_v5  ;;  %v2135_v12 = vpop.f32.mrb[12].mxu1  ;;  %v2056_v13 = vpop.f32.mrb[13].mxu0  ;;  %2542 = vmatprep.subr.bf16.mxu0 %v2541_v4 }
 0x1ec   : > { %v2057_v15 = vadd.f32 %v2056_v13, %v2055_v10  ;;  %v2136_v16 = vpop.f32.mrb[13].mxu1 }
 0x1ed   : > { %v2137_v19 = vadd.f32 %v2136_v16, %v2135_v12  ;;  %2300 = vmatmul.mubr.f32.gmra.mrb[36].mxu0 %v919_v11 }
 0x1ee   : > { %v2058_v20 = vpop.f32.mrb[14].mxu0  ;;  %2544 = vmatpush3.bf16.msra.mxu0 %v2541_v4 }
 0x1ef   : > { %v924_v21 = vadd.f32 %v2137_v19, %v2057_v15  ;;  %v2138_v22 = vpop.f32.mrb[14].mxu1  ;;  %v2059_v23 = vpop.f32.mrb[15].mxu0  ;;  %2546 = vmatprep.subr.bf16.mxu0 %v2545_v14 }
 0x1f0   : > { %v2060_v25 = vadd.f32 %v2059_v23, %v2058_v20  ;;  %v2139_v26 = vpop.f32.mrb[15].mxu1 }
 0x1f1   : > { %v2140_v29 = vadd.f32 %v2139_v26, %v2138_v22  ;;  %2302 = vmatprep.mubr.f32.mxu0 %v924_v21  ;;  %v1009_v26 = vld [vmem:[%s3415_s20 + $0x10] sm:$0xff] }
 0x1f2   : > { %v2061_v30 = vpop.f32.mrb[16].mxu0  ;;  %2548 = vmatpush3.bf16.msra.mxu0 %v2545_v14 }
 0x1f3   : > { %v929_v31 = vadd.f32 %v2140_v29, %v2060_v25  ;;  %v2141_v32 = vpop.f32.mrb[16].mxu1  ;;  %v2062_v33 = vpop.f32.mrb[17].mxu0  ;;  %2550 = vmatprep.subr.bf16.mxu0 %v2549_v24  ;;  %v1008_v25 = vld [vmem:[%s3415_s20 + $0x8] sm:$0xff] }
 0x1f4   : > { %v2063_v35 = vadd.f32 %v2062_v33, %v2061_v30  ;;  %v2142_v36 = vpop.f32.mrb[17].mxu1  ;;  %v1012_v29 = vld [vmem:[%s3415_s20 + $0x28] sm:$0xff]  ;;  %v1013_v30 = vld [vmem:[%s3415_s20 + $0x30] sm:$0xff] }
 0x1f5   : > { %v2143_v37 = vadd.f32 %v2142_v36, %v2141_v32  ;;  %2303 = vmatmul.mubr.f32.gmra.mrb[38].mxu0 %v929_v31  ;;  %v1014_v31 = vld [vmem:[%s3415_s20 + $0x38] sm:$0xff]  ;;  %v1015_v32 = vld [vmem:[%s3415_s20 + $0x40] sm:$0xff]  ;;  %v1016_v33 = vld [vmem:[%s3415_s20 + $0x48] sm:$0xff] }
 0x1f6   : > { %v2064_v38 = vpop.f32.mrb[18].mxu0  ;;  %2552 = vmatpush3.bf16.msra.mxu0 %v2549_v24  ;;  %v1007_v24 = vld [vmem:[%s3415_s20] sm:$0xff] }
 0x1f7   : > { %v934_v39 = vadd.f32 %v2143_v37, %v2063_v35  ;;  %v2144_v40 = vpop.f32.mrb[18].mxu1  ;;  %v2065_v41 = vpop.f32.mrb[19].mxu0  ;;  %2554 = vmatprep.subr.bf16.mxu0 %v2553_v34  ;;  %v1018_v35 = vld [vmem:[%s3415_s20 + $0x58] sm:$0xff]  ;;  %v1019_v36 = vld [vmem:[%s3415_s20 + $0x60] sm:$0xff]  ;;  %v1020_v37 = vld [vmem:[%s3415_s20 + $0x68] sm:$0xff] }
 0x1f8   : > { %v2066_v42 = vadd.f32 %v2065_v41, %v2064_v38  ;;  %v2145_v43 = vpop.f32.mrb[19].mxu1  ;;  %v1021_v38 = vld [vmem:[%s3415_s20 + $0x70] sm:$0xff] }
 0x1f9   : > { %v2146_v44 = vadd.f32 %v2145_v43, %v2144_v40  ;;  %2305 = vmatprep.mubr.f32.mxu0 %v934_v39  ;;  %v1022_v39 = vld [vmem:[%s3415_s20 + $0x78] sm:$0xff]  ;;  %v3528_v40 = vld [vmem:[%s3809_s5] ss:$0 sm:$0xff] }
 0x1fa   : > { %v2067_v45 = vpop.f32.mrb[20].mxu0  ;;  %2556 = vmatpush3.bf16.msra.mxu0 %v2553_v34  ;;  %v1017_v34 = vld [vmem:[%s3415_s20 + $0x50] sm:$0xff]  ;;  %s3677_s20 = scalar_lea.hbm %s3858_s12, %s2003_s30 }
 0x1fb   : > { %v939_v46 = vadd.f32 %v2146_v44, %v2066_v42  ;;  %v2147_v47 = vpop.f32.mrb[20].mxu1  ;;  %v2068_v48 = vpop.f32.mrb[21].mxu0 }
 0x1fc   : > { %v2069_v49 = vadd.f32 %v2068_v48, %v2067_v45  ;;  %v2148_v50 = vpop.f32.mrb[21].mxu1 }
 0x1fd   : > { %v2149_v51 = vadd.f32 %v2148_v50, %v2147_v47  ;;  %2306 = vmatmul.mubr.f32.gmra.mrb[40].mxu0 %v939_v46 }
 0x1fe   : > { %v2070_v52 = vpop.f32.mrb[22].mxu0 }
 0x1ff   : > { %v944_v53 = vadd.f32 %v2149_v51, %v2069_v49  ;;  %v2150_v54 = vpop.f32.mrb[22].mxu1  ;;  %v2071_v55 = vpop.f32.mrb[23].mxu0 }
 0x200   : > { %v2072_v56 = vadd.f32 %v2071_v55, %v2070_v52  ;;  %v2151_v57 = vpop.f32.mrb[23].mxu1 }
 0x201   : > { %v2152_v59 = vadd.f32 %v2151_v57, %v2150_v54  ;;  %2308 = vmatprep.mubr.f32.mxu0 %v944_v53 }
 0x202   : > { %v2073_v60 = vpop.f32.mrb[24].mxu0 }
 0x203   : > { %v949_v58 = vadd.f32 %v2152_v59, %v2072_v56  ;;  %v2153_v61 = vpop.f32.mrb[24].mxu1  ;;  %v2074_v62 = vpop.f32.mrb[25].mxu0 }
 0x204   : > { %v2075_v63 = vadd.f32 %v2074_v62, %v2073_v60  ;;  %v2154_v0 = vpop.f32.mrb[25].mxu1 }
 0x205   : > { %v2155_v1 = vadd.f32 %v2154_v0, %v2153_v61  ;;  %2309 = vmatmul.mubr.f32.gmra.mrb[42].mxu0 %v949_v58 }
 0x206   : > { %v2076_v2 = vpop.f32.mrb[26].mxu0 }
 0x207   : > { %v954_v3 = vadd.f32 %v2155_v1, %v2075_v63  ;;  %v2156_v4 = vpop.f32.mrb[26].mxu1  ;;  %v2077_v5 = vpop.f32.mrb[27].mxu0 }
 0x208   : > { %v2078_v6 = vadd.f32 %v2077_v5, %v2076_v2  ;;  %v2157_v7 = vpop.f32.mrb[27].mxu1 }
 0x209   : > { %v2158_v8 = vadd.f32 %v2157_v7, %v2156_v4  ;;  %2311 = vmatprep.mubr.f32.mxu0 %v954_v3 }
 0x20a   : > { %v2079_v9 = vpop.f32.mrb[28].mxu0 }
 0x20b   : > { %v959_v10 = vadd.f32 %v2158_v8, %v2078_v6  ;;  %v2159_v11 = vpop.f32.mrb[28].mxu1  ;;  %v2080_v12 = vpop.f32.mrb[29].mxu0 }
 0x20c   : > { %v2081_v13 = vadd.f32 %v2080_v12, %v2079_v9  ;;  %v2160_v14 = vpop.f32.mrb[29].mxu1 }
 0x20d   : > { %v2161_v15 = vadd.f32 %v2160_v14, %v2159_v11  ;;  %2312 = vmatmul.mubr.f32.gmra.mrb[44].mxu0 %v959_v10 }
 0x20e   : > { %v2082_v16 = vpop.f32.mrb[30].mxu0 }
 0x20f   : > { %v964_v17 = vadd.f32 %v2161_v15, %v2081_v13  ;;  %v2162_v18 = vpop.f32.mrb[30].mxu1  ;;  %v2083_v19 = vpop.f32.mrb[31].mxu0 }
 0x210   : > { %v2084_v20 = vadd.f32 %v2083_v19, %v2082_v16  ;;  %v2163_v21 = vpop.f32.mrb[31].mxu1 }
 0x211   : > { %v2164_v22 = vadd.f32 %v2163_v21, %v2162_v18  ;;  %2314 = vmatprep.mubr.f32.mxu0 %v964_v17 }
 0x213   : > { %v969_v23 = vadd.f32 %v2164_v22, %v2084_v20 }
 0x215   : > { %2315 = vmatmul.mubr.f32.gmra.mrb[46].mxu0 %v969_v23 }
 0x216   : > { %2349 = vmatprep.mubr.f32.mxu0 %v1007_v24 }
 0x219   : > { %2350 = vmatmul.mubr.f32.vlgmr.msra.gmra.mrb[32].mxu0 %v1008_v25  ;;  %v3568_v25 = vld [vmem:[%s3811_s7] ss:$0 sm:$0xff] }
 0x21a   : > { %2352 = vmatprep.mubr.f32.mxu0 %v1009_v26 }
 0x21d   : > { %2353 = vmatmul.mubr.f32.gmra.mrb[34].mxu0 %v1010_v27  ;;  %v3573_v27 = vld [vmem:[%s3856_s29] ss:$0 sm:$0xff] }
 0x21e   : > { %2355 = vmatprep.mubr.f32.mxu0 %v1011_v28 }
 0x221   : > { %2356 = vmatmul.mubr.f32.gmra.mrb[36].mxu0 %v1012_v29 }
 0x222   : > { %2358 = vmatprep.mubr.f32.mxu0 %v1013_v30 }
 0x225   : > { %2359 = vmatmul.mubr.f32.gmra.mrb[38].mxu0 %v1014_v31 }
 0x226   : > { %2361 = vmatprep.mubr.f32.mxu0 %v1015_v32 }
 0x229   : > { %2362 = vmatmul.mubr.f32.gmra.mrb[40].mxu0 %v1016_v33 }
 0x22a   : > { %2364 = vmatprep.mubr.f32.mxu0 %v1017_v34 }
 0x22d   : > { %2365 = vmatmul.mubr.f32.gmra.mrb[42].mxu0 %v1018_v35 }
 0x22e   : > { %2367 = vmatprep.mubr.f32.mxu0 %v1019_v36 }
 0x231   : > { %2368 = vmatmul.mubr.f32.gmra.mrb[44].mxu0 %v1020_v37 }
 0x232   : > { %2370 = vmatprep.mubr.f32.mxu0 %v1021_v38 }
 0x235   : > { %2371 = vmatmul.mubr.f32.gmra.mrb[46].mxu0 %v1022_v39 }
 0x2ec   : > { %v2351_v41 = vpop.f32.mrb[32].mxu0 }
 0x2ed   : > { %v1369_v42 = vadd.f32 %v2351_v41, %v3528_v40  ;;  %v1282_v43 = vpop.f32.mrb[33].mxu0 }
 0x2ee   : > { %v1368_v44 = vadd.f32 %v3528_v40, %v1282_v43 }
 0x2ef   : > { %v1385_v45 = vmax.f32 %v1369_v42, 0.0 }
 0x2f0   : > { %v1384_v46 = vmax.f32 %v1368_v44, 0.0  ;;  %v2354_v47 = vpop.f32.mrb[34].mxu0 }
 0x2f1   : > { %1401 = vst [vmem:[%s3533_s24 + $0x8] sm:$0xff] %v1385_v45  ;;  %v1371_v48 = vadd.f32 %v2354_v47, %v3528_v40  ;;  %v1292_v49 = vpop.f32.mrb[35].mxu0 }
 0x2f2   : > { %1400 = vst [vmem:[%s3533_s24] sm:$0xff] %v1384_v46  ;;  %v1370_v50 = vadd.f32 %v3528_v40, %v1292_v49  ;;  %2405 = vmatprep.mubr.f32.mxu1 %v1384_v46 }
 0x2f3   : > { %v1387_v51 = vmax.f32 %v1371_v48, 0.0  ;;  %2406 = vmatmul.mubr.f32.vlgmr.msra.gmra.mrb[32].mxu1 %v1385_v45 }
 0x2f4   : > { %v1386_v52 = vmax.f32 %v1370_v50, 0.0  ;;  %v2357_v53 = vpop.f32.mrb[36].mxu0 }
 0x2f5   : > { %1403 = vst [vmem:[%s3533_s24 + $0x18] sm:$0xff] %v1387_v51  ;;  %v1373_v54 = vadd.f32 %v2357_v53, %v3528_v40  ;;  %v1302_v55 = vpop.f32.mrb[37].mxu0 }
 0x2f6   : > { %1402 = vst [vmem:[%s3533_s24 + $0x10] sm:$0xff] %v1386_v52  ;;  %v1372_v56 = vadd.f32 %v3528_v40, %v1302_v55  ;;  %2408 = vmatprep.mubr.f32.mxu1 %v1386_v52 }
 0x2f7   : > { %v1389_v57 = vmax.f32 %v1373_v54, 0.0  ;;  %2409 = vmatmul.mubr.f32.gmra.mrb[34].mxu1 %v1387_v51 }
 0x2f8   : > { %v1388_v59 = vmax.f32 %v1372_v56, 0.0  ;;  %v2360_v60 = vpop.f32.mrb[38].mxu0 }
 0x2f9   : > { %1405 = vst [vmem:[%s3533_s24 + $0x28] sm:$0xff] %v1389_v57  ;;  %v1375_v58 = vadd.f32 %v2360_v60, %v3528_v40  ;;  %v1312_v61 = vpop.f32.mrb[39].mxu0 }
 0x2fa   : > { %1404 = vst [vmem:[%s3533_s24 + $0x20] sm:$0xff] %v1388_v59  ;;  %v1374_v62 = vadd.f32 %v3528_v40, %v1312_v61  ;;  %2411 = vmatprep.mubr.f32.mxu1 %v1388_v59 }
 0x2fb   : > { %v1391_v63 = vmax.f32 %v1375_v58, 0.0  ;;  %2412 = vmatmul.mubr.f32.gmra.mrb[36].mxu1 %v1389_v57 }
 0x2fc   : > { %v1390_v0 = vmax.f32 %v1374_v62, 0.0  ;;  %v2363_v1 = vpop.f32.mrb[40].mxu0 }
 0x2fd   : > { %1407 = vst [vmem:[%s3533_s24 + $0x38] sm:$0xff] %v1391_v63  ;;  %v1377_v2 = vadd.f32 %v2363_v1, %v3528_v40  ;;  %v1322_v3 = vpop.f32.mrb[41].mxu0 }
 0x2fe   : > { %1406 = vst [vmem:[%s3533_s24 + $0x30] sm:$0xff] %v1390_v0  ;;  %v1376_v4 = vadd.f32 %v3528_v40, %v1322_v3  ;;  %2414 = vmatprep.mubr.f32.mxu1 %v1390_v0 }
 0x2ff   : > { %v1393_v5 = vmax.f32 %v1377_v2, 0.0  ;;  %2415 = vmatmul.mubr.f32.gmra.mrb[38].mxu1 %v1391_v63 }
 0x300   : > { %v1392_v6 = vmax.f32 %v1376_v4, 0.0  ;;  %v2366_v7 = vpop.f32.mrb[42].mxu0 }
 0x301   : > { %1409 = vst [vmem:[%s3533_s24 + $0x48] sm:$0xff] %v1393_v5  ;;  %v1379_v8 = vadd.f32 %v2366_v7, %v3528_v40  ;;  %v1332_v9 = vpop.f32.mrb[43].mxu0 }
 0x302   : > { %1408 = vst [vmem:[%s3533_s24 + $0x40] sm:$0xff] %v1392_v6  ;;  %v1378_v10 = vadd.f32 %v3528_v40, %v1332_v9  ;;  %2417 = vmatprep.mubr.f32.mxu1 %v1392_v6 }
 0x303   : > { %v1395_v11 = vmax.f32 %v1379_v8, 0.0  ;;  %2418 = vmatmul.mubr.f32.gmra.mrb[40].mxu1 %v1393_v5 }
 0x304   : > { %v1394_v12 = vmax.f32 %v1378_v10, 0.0  ;;  %v2369_v13 = vpop.f32.mrb[44].mxu0 }
 0x305   : > { %1411 = vst [vmem:[%s3533_s24 + $0x58] sm:$0xff] %v1395_v11  ;;  %v1381_v14 = vadd.f32 %v2369_v13, %v3528_v40  ;;  %v1342_v15 = vpop.f32.mrb[45].mxu0 }
 0x306   : > { %1410 = vst [vmem:[%s3533_s24 + $0x50] sm:$0xff] %v1394_v12  ;;  %v1380_v16 = vadd.f32 %v3528_v40, %v1342_v15  ;;  %2420 = vmatprep.mubr.f32.mxu1 %v1394_v12 }
 0x307   : > { %v1397_v17 = vmax.f32 %v1381_v14, 0.0  ;;  %2421 = vmatmul.mubr.f32.gmra.mrb[42].mxu1 %v1395_v11 }
 0x308   : > { %v1396_v18 = vmax.f32 %v1380_v16, 0.0  ;;  %v2372_v19 = vpop.f32.mrb[46].mxu0 }
 0x309   : > { %1413 = vst [vmem:[%s3533_s24 + $0x68] sm:$0xff] %v1397_v17  ;;  %v1383_v20 = vadd.f32 %v2372_v19, %v3528_v40  ;;  %v1352_v21 = vpop.f32.mrb[47].mxu0 }
 0x30a   : > { %1412 = vst [vmem:[%s3533_s24 + $0x60] sm:$0xff] %v1396_v18  ;;  %v1382_v22 = vadd.f32 %v3528_v40, %v1352_v21  ;;  %2423 = vmatprep.mubr.f32.mxu1 %v1396_v18 }
 0x30b   : > { %v1399_v23 = vmax.f32 %v1383_v20, 0.0  ;;  %2424 = vmatmul.mubr.f32.gmra.mrb[44].mxu1 %v1397_v17 }
 0x30c   : > { %v1398_v24 = vmax.f32 %v1382_v22, 0.0 }
 0x30d   : > { %1415 = vst [vmem:[%s3533_s24 + $0x78] sm:$0xff] %v1399_v23 }
 0x30e   : > { %1414 = vst [vmem:[%s3533_s24 + $0x70] sm:$0xff] %v1398_v24  ;;  %2426 = vmatprep.mubr.f32.mxu1 %v1398_v24 }
 0x30f   : > { %2427 = vmatmul.mubr.f32.gmra.mrb[46].mxu1 %v1399_v23 }
 0x3c6   : > { %v2407_v26 = vpop.f32.mrb[32].mxu1 }
 0x3c7   : > { %v1511_v28 = vadd.f32 %v2407_v26, %v3568_v25  ;;  %v1505_v29 = vpop.f32.mrb[33].mxu1 }
 0x3c8   : > { %v1506_v30 = vadd.f32 %v3568_v25, %v1505_v29 }
 0x3c9   : > { %v1608_v31 = vmul.f32 %v3573_v27, %v1511_v28  ;;  %vm1585_vm0 = vcmp.ge.f32.partialorder %v1511_v28, 0.0 }
 0x3ca   : > { %v1607_v32 = vmul.f32 %v3573_v27, %v1506_v30  ;;  %v2410_v33 = vpop.f32.mrb[34].mxu1  ;;  %vm1584_vm1 = vcmp.ge.f32.partialorder %v1506_v30, 0.0 }
 0x3cb   : > { %v1521_v34 = vadd.f32 %v2410_v33, %v3568_v25  ;;  %v1515_v35 = vpop.f32.mrb[35].mxu1  ;;  %v3580_v36 = vsel %vm1585_vm0, %v1511_v28, %v1608_v31 }
 0x3cc   : > { %v1516_v37 = vadd.f32 %v3568_v25, %v1515_v35  ;;  %v1640_v38 = vmul.f32 %v3580_v36, %v3580_v36  ;;  %v3586_v40 = vsel %vm1584_vm1, %v1506_v30, %v1607_v32 }
 0x3cd   : > { %v1610_v39 = vmul.f32 %v3573_v27, %v1521_v34  ;;  %vm1587_vm2 = vcmp.ge.f32.partialorder %v1521_v34, 0.0  ;;  %v1639_v47 = vmul.f32 %v3586_v40, %v3586_v40 }
 0x3ce   : > { %v1609_v41 = vmul.f32 %v3573_v27, %v1516_v37  ;;  %1657 = vadd.xlane.f32.xlu0 %v1640_v38  ;;  %v2413_v42 = vpop.f32.mrb[36].mxu1  ;;  %vm1586_vm3 = vcmp.ge.f32.partialorder %v1516_v37, 0.0 }
 0x3cf   : > { %v1531_v43 = vadd.f32 %v2413_v42, %v3568_v25  ;;  %v1525_v44 = vpop.f32.mrb[37].mxu1  ;;  %v3590_v45 = vsel %vm1587_vm2, %v1521_v34, %v1610_v39 }
 0x3d0   : > { %v1526_v46 = vadd.f32 %v3568_v25, %v1525_v44  ;;  %v1642_v48 = vmul.f32 %v3590_v45, %v3590_v45  ;;  %v3598_v50 = vsel %vm1586_vm3, %v1516_v37, %v1609_v41 }
 0x3d1   : > { %v1612_v49 = vmul.f32 %v3573_v27, %v1531_v43  ;;  %vm1589_vm5 = vcmp.ge.f32.partialorder %v1531_v43, 0.0  ;;  %v1641_v56 = vmul.f32 %v3598_v50, %v3598_v50 }
 0x3d2   : > { %v1611_v51 = vmul.f32 %v3573_v27, %v1526_v46  ;;  %1655 = vadd.xlane.f32.xlu0 %v1639_v47  ;;  %1661 = vadd.xlane.f32.xlu1 %v1642_v48  ;;  %v2416_v52 = vpop.f32.mrb[38].mxu1  ;;  %vm1588_vm4 = vcmp.ge.f32.partialorder %v1526_v46, 0.0 }
 0x3d3   : > { %v1541_v53 = vadd.f32 %v2416_v52, %v3568_v25  ;;  %v1535_v54 = vpop.f32.mrb[39].mxu1  ;;  %v3610_v58 = vsel %vm1589_vm5, %v1531_v43, %v1612_v49 }
 0x3d4   : > { %v1536_v55 = vadd.f32 %v3568_v25, %v1535_v54  ;;  %v3605_v57 = vsel %vm1588_vm4, %v1526_v46, %v1611_v51  ;;  %v1644_v2 = vmul.f32 %v3610_v58, %v3610_v58 }
 0x3d5   : > { %v1614_v59 = vmul.f32 %v3573_v27, %v1541_v53  ;;  %v1643_v60 = vmul.f32 %v3605_v57, %v3605_v57  ;;  %vm1591_vm7 = vcmp.ge.f32.partialorder %v1541_v53, 0.0 }
 0x3d6   : > { %v1613_v61 = vmul.f32 %v3573_v27, %v1536_v55  ;;  %1659 = vadd.xlane.f32.xlu1 %v1641_v56  ;;  %v2419_v62 = vpop.f32.mrb[40].mxu1  ;;  %vm1590_vm6 = vcmp.ge.f32.partialorder %v1536_v55, 0.0 }
 0x3d7   : > { %v1551_v63 = vadd.f32 %v2419_v62, %v3568_v25  ;;  %1663 = vadd.xlane.f32.xlu0 %v1643_v60  ;;  %v1545_v0 = vpop.f32.mrb[41].mxu1  ;;  %v3622_v6 = vsel %vm1591_vm7, %v1541_v53, %v1614_v59 }
 0x3d8   : > { %v1546_v1 = vadd.f32 %v3568_v25, %v1545_v0  ;;  %v3617_v3 = vsel %vm1590_vm6, %v1536_v55, %v1613_v61  ;;  %v1646_v12 = vmul.f32 %v3622_v6, %v3622_v6 }
 0x3d9   : > { %v1616_v4 = vmul.f32 %v3573_v27, %v1551_v63  ;;  %v1645_v5 = vmul.f32 %v3617_v3, %v3617_v3  ;;  %vm1593_vm9 = vcmp.ge.f32.partialorder %v1551_v63, 0.0 }
 0x3da   : > { %v1615_v7 = vmul.f32 %v3573_v27, %v1546_v1  ;;  %1665 = vadd.xlane.f32.xlu1 %v1644_v2  ;;  %v2422_v8 = vpop.f32.mrb[42].mxu1  ;;  %vm1592_vm8 = vcmp.ge.f32.partialorder %v1546_v1, 0.0 }
 0x3db   : > { %v1561_v9 = vadd.f32 %v2422_v8, %v3568_v25  ;;  %1667 = vadd.xlane.f32.xlu0 %v1645_v5  ;;  %v1555_v10 = vpop.f32.mrb[43].mxu1  ;;  %v3634_v16 = vsel %vm1593_vm9, %v1551_v63, %v1616_v4 }
 0x3dc   : > { %v1556_v11 = vadd.f32 %v3568_v25, %v1555_v10  ;;  %v3629_v13 = vsel %vm1592_vm8, %v1546_v1, %v1615_v7  ;;  %v1648_v22 = vmul.f32 %v3634_v16, %v3634_v16 }
 0x3dd   : > { %v1618_v14 = vmul.f32 %v3573_v27, %v1561_v9  ;;  %v1647_v15 = vmul.f32 %v3629_v13, %v3629_v13  ;;  %vm1595_vm11 = vcmp.ge.f32.partialorder %v1561_v9, 0.0 }
 0x3de   : > { %v1617_v17 = vmul.f32 %v3573_v27, %v1556_v11  ;;  %1669 = vadd.xlane.f32.xlu1 %v1646_v12  ;;  %v2425_v18 = vpop.f32.mrb[44].mxu1  ;;  %vm1594_vm10 = vcmp.ge.f32.partialorder %v1556_v11, 0.0 }
 0x3df   : > { %v1571_v19 = vadd.f32 %v2425_v18, %v3568_v25  ;;  %1671 = vadd.xlane.f32.xlu0 %v1647_v15  ;;  %v1565_v20 = vpop.f32.mrb[45].mxu1  ;;  %v3646_v28 = vsel %vm1595_vm11, %v1561_v9, %v1618_v14 }
 0x3e0   : > { %v1566_v21 = vadd.f32 %v3568_v25, %v1565_v20  ;;  %v3641_v23 = vsel %vm1594_vm10, %v1556_v11, %v1617_v17  ;;  %v1650_v34 = vmul.f32 %v3646_v28, %v3646_v28 }
 0x3e1   : > { %v1620_v24 = vmul.f32 %v3573_v27, %v1571_v19  ;;  %v1649_v26 = vmul.f32 %v3641_v23, %v3641_v23  ;;  %vm1597_vm13 = vcmp.ge.f32.partialorder %v1571_v19, 0.0 }
 0x3e2   : > { %v1619_v29 = vmul.f32 %v3573_v27, %v1566_v21  ;;  %1673 = vadd.xlane.f32.xlu1 %v1648_v22  ;;  %v2428_v30 = vpop.f32.mrb[46].mxu1  ;;  %vm1596_vm12 = vcmp.ge.f32.partialorder %v1566_v21, 0.0 }
 0x3e3   : > { %v1581_v31 = vadd.f32 %v2428_v30, %v3568_v25  ;;  %1675 = vadd.xlane.f32.xlu0 %v1649_v26  ;;  %v1575_v32 = vpop.f32.mrb[47].mxu1  ;;  %v3658_v39 = vsel %vm1597_vm13, %v1571_v19, %v1620_v24 }
 0x3e4   : > { %v1576_v33 = vadd.f32 %v3568_v25, %v1575_v32  ;;  %v3653_v35 = vsel %vm1596_vm12, %v1566_v21, %v1619_v29  ;;  %v1652_v25 = vmul.f32 %v3658_v39, %v3658_v39 }
 0x3e5   : > { %v1622_v37 = vmul.f32 %v3573_v27, %v1581_v31  ;;  %v1651_v38 = vmul.f32 %v3653_v35, %v3653_v35  ;;  %vm1599_vm15 = vcmp.ge.f32.partialorder %v1581_v31, 0.0 }
 0x3e6   : > { %v1621_v41 = vmul.f32 %v3573_v27, %v1576_v33  ;;  %1677 = vadd.xlane.f32.xlu1 %v1650_v34  ;;  %vm1598_vm14 = vcmp.ge.f32.partialorder %v1576_v33, 0.0 }
 0x3e7   : > { %1679 = vadd.xlane.f32.xlu0 %v1651_v38  ;;  %v3667_v44 = vsel %vm1599_vm15, %v1581_v31, %v1622_v37 }
 0x3e8   : > { %v3663_v42 = vsel %vm1598_vm14, %v1576_v33, %v1621_v41  ;;  %v1654_v27 = vmul.f32 %v3667_v44, %v3667_v44 }
 0x3e9   : > { %v1653_v43 = vmul.f32 %v3663_v42, %v3663_v42 }
 0x3ea   : > { %1681 = vadd.xlane.f32.xlu1 %v1652_v25 }
 0x3eb   : > { %1683 = vadd.xlane.f32.xlu0 %v1653_v43 }
 0x3ee   : > { %1685 = vadd.xlane.f32.xlu1 %v1654_v27 }
 0x3ef   : > { %2941 = shalt.err (!%p2938_p6)
}
 0x3f0   : > { %s2942_s24 = scalar_lea.hbm %s3677_s20, 2048  ;;  %s2946_s16 = scalar_lea.hbm %s3858_s12, 4096 }
 0x3f1   : > { %p2943_p7 = scmp.ne.s32.totalorder %s3677_s20, %s2942_s24  ;;  %p2947_p2 = scmp.lt.u32.totalorder %s3677_s20, %s3858_s12 }
 0x3f2   : > { %p2948_p13 = scmp.lt.u32.totalorder %s2946_s16, %s2942_s24  ;;  %p2950_p1 = scmp.lt.u32.totalorder %s2942_s24, %s3677_s20 }
 0x3f3   : > { %p2944_p9 = pnand %p2943_p7, %p3309_p5 }
 0x3f4   : > { %p2949_p4 = por %p2948_p13, %p2947_p2 }
 0x3f5   : > { %p2945_p0 = pneg %p2944_p9 }
 0x3f6   : > { %p2951_p8 = por %p2950_p1, %p2949_p4 }
 0x3f8   : > { %p2952_p10 = pnand %p2951_p8, %p2945_p0 }
 0x3fa   : > { %2955 = shalt.err (!%p2952_p10)
}
 0x3fb   : > { %s3071_s4 = smov 128   ;;  %s3072_s26 = smov 8  }
 0x3fc   : > { %2625 = dma.vmem_to_hbm [thread:$0]  (%p3309_p5), %s3680_s0, 2048, %s3677_s20, %s1752_s3, %s3071_s4, %s3071_s4, %s3072_s26  }
 0x3fd   : > { %s3711_s20 = scalar_lea.vmem [#allocation15], %s3411_s11  ;;  %s3859_s23 = sld [smem:[#allocation33_spill]] }
 0x3fe   : > { %s1786_s11 = sshll.u32 %s3711_s20, 4  ;;  %s1757_s19 = scalar_lea.sflag [#allocation16], %s3408_s10  ;;  %s3751_s11 = int_to_ptr.vmem [resolvable:$true] %s1786_s11 }
 0x3ff   : > { %s2956_s21 = scalar_lea.vmem %s3751_s11, 2048  ;;  %s3073_s24 = smov [#allocation15]  }
 0x400   : > { %p2957_p3 = scmp.ne.s32.totalorder %s3751_s11, %s2956_s21  ;;  %s2960_s25 = sshll.u32 %s3073_s24, 4  ;;  %s2961_s25 = int_to_ptr.vmem [resolvable:$false] %s2960_s25 }
 0x401   : > { %s2962_s22 = scalar_lea.vmem %s2961_s25, 4096  ;;  %p2963_p6 = scmp.lt.s32.totalorder %s3751_s11, %s2961_s25 }
 0x402   : > { %p2958_p11 = pnand %p2957_p3, %p3309_p5  ;;  %p2964_p7 = scmp.lt.s32.totalorder %s2962_s22, %s2956_s21 }
 0x403   : > { %s3749_s8 = scalar_lea.hbm %s3859_s23, %s2003_s30 }
 0x404   : > { %p2959_p12 = pneg %p2958_p11  ;;  %p2965_p9 = por %p2964_p7, %p2963_p6 }
 0x406   : > { %p2966_p0 = pnand %p2965_p9, %p2959_p12 }
 0x45b   : > { %v1658_v46 = vpop.xlane.xlu0 %1657 }
 0x45c   : > { %v1688_v47 = vmax.f32 %v1658_v46, 1e-24 }
 0x45e   : > { %2724 = vrsqrt.f32 %v1688_v47 }
 0x45f   : > { %v1656_v48 = vpop.xlane.xlu0 %1655  ;;  %v1662_v49 = vpop.xlane.xlu1 %1661 }
 0x460   : > { %v1687_v51 = vmax.f32 %v1656_v48, 1e-24  ;;  %v1690_v52 = vmax.f32 %v1662_v49, 1e-24 }
 0x462   : > { %2726 = vrsqrt.f32 %v1687_v51 }
 0x463   : > { %2728 = vrsqrt.f32 %v1690_v52  ;;  %v1660_v53 = vpop.xlane.xlu1 %1659 }
 0x464   : > { %v1689_v54 = vmax.f32 %v1660_v53, 1e-24  ;;  %v1664_v55 = vpop.xlane.xlu0 %1663 }
 0x465   : > { %v1691_v56 = vmax.f32 %v1664_v55, 1e-24 }
 0x466   : > { %2730 = vrsqrt.f32 %v1689_v54 }
 0x467   : > { %2732 = vrsqrt.f32 %v1691_v56  ;;  %v1666_v59 = vpop.xlane.xlu1 %1665 }
 0x468   : > { %v2725_v60 = vpop.eup %2724  ;;  %v1692_v61 = vmax.f32 %v1666_v59, 1e-24  ;;  %v1668_v62 = vpop.xlane.xlu0 %1667 }
 0x469   : > { %v1720_v63 = vmul.f32 %v2725_v60, %v3580_v36  ;;  %v1693_v0 = vmax.f32 %v1668_v62, 1e-24 }
 0x46a   : > { %2734 = vrsqrt.f32 %v1692_v61 }
 0x46b   : > { %1736 = vst [vmem:[%s3711_s20 + $0x8] sm:$0xff] %v1720_v63  ;;  %2736 = vrsqrt.f32 %v1693_v0  ;;  %v1670_v1 = vpop.xlane.xlu1 %1669 }
 0x46c   : > { %v2727_v2 = vpop.eup %2726  ;;  %v1694_v4 = vmax.f32 %v1670_v1, 1e-24  ;;  %v1672_v5 = vpop.xlane.xlu0 %1671 }
 0x46d   : > { %v2729_v7 = vpop.eup %2728  ;;  %v1719_v8 = vmul.f32 %v2727_v2, %v3586_v40  ;;  %v1695_v9 = vmax.f32 %v1672_v5, 1e-24 }
 0x46e   : > { %v1722_v36 = vmul.f32 %v2729_v7, %v3590_v45  ;;  %2738 = vrsqrt.f32 %v1694_v4 }
 0x46f   : > { %1735 = vst [vmem:[%s3711_s20] sm:$0xff] %v1719_v8  ;;  %2740 = vrsqrt.f32 %v1695_v9  ;;  %v1674_v10 = vpop.xlane.xlu1 %1673 }
 0x470   : > { %v2731_v11 = vpop.eup %2730  ;;  %1738 = vst [vmem:[%s3711_s20 + $0x18] sm:$0xff] %v1722_v36  ;;  %v1696_v12 = vmax.f32 %v1674_v10, 1e-24  ;;  %v1676_v14 = vpop.xlane.xlu0 %1675 }
 0x471   : > { %v2733_v15 = vpop.eup %2732  ;;  %v1721_v17 = vmul.f32 %v2731_v11, %v3598_v50  ;;  %v1697_v18 = vmax.f32 %v1676_v14, 1e-24 }
 0x472   : > { %v1723_v40 = vmul.f32 %v2733_v15, %v3605_v57  ;;  %2742 = vrsqrt.f32 %v1696_v12 }
 0x473   : > { %1737 = vst [vmem:[%s3711_s20 + $0x10] sm:$0xff] %v1721_v17  ;;  %2744 = vrsqrt.f32 %v1697_v18  ;;  %v1678_v45 = vpop.xlane.xlu1 %1677 }
 0x474   : > { %v2735_v19 = vpop.eup %2734  ;;  %1739 = vst [vmem:[%s3711_s20 + $0x20] sm:$0xff] %v1723_v40  ;;  %v1698_v20 = vmax.f32 %v1678_v45, 1e-24  ;;  %v1680_v21 = vpop.xlane.xlu0 %1679 }
 0x475   : > { %v2737_v22 = vpop.eup %2736  ;;  %v1724_v24 = vmul.f32 %v2735_v19, %v3610_v58  ;;  %v1699_v26 = vmax.f32 %v1680_v21, 1e-24 }
 0x476   : > { %v1725_v50 = vmul.f32 %v2737_v22, %v3617_v3  ;;  %2746 = vrsqrt.f32 %v1698_v20 }
 0x477   : > { %1740 = vst [vmem:[%s3711_s20 + $0x28] sm:$0xff] %v1724_v24  ;;  %2748 = vrsqrt.f32 %v1699_v26  ;;  %v1682_v57 = vpop.xlane.xlu1 %1681 }
 0x478   : > { %v2739_v29 = vpop.eup %2738  ;;  %1741 = vst [vmem:[%s3711_s20 + $0x30] sm:$0xff] %v1725_v50  ;;  %v1700_v30 = vmax.f32 %v1682_v57, 1e-24  ;;  %v1684_v31 = vpop.xlane.xlu0 %1683 }
 0x479   : > { %v2741_v32 = vpop.eup %2740  ;;  %v1726_v33 = vmul.f32 %v2739_v29, %v3622_v6  ;;  %v1701_v34 = vmax.f32 %v1684_v31, 1e-24 }
 0x47a   : > { %v1727_v58 = vmul.f32 %v2741_v32, %v3629_v13  ;;  %2750 = vrsqrt.f32 %v1700_v30 }
 0x47b   : > { %1742 = vst [vmem:[%s3711_s20 + $0x38] sm:$0xff] %v1726_v33  ;;  %2752 = vrsqrt.f32 %v1701_v34  ;;  %v1686_v3 = vpop.xlane.xlu1 %1685 }
 0x47c   : > { %v2743_v37 = vpop.eup %2742  ;;  %1743 = vst [vmem:[%s3711_s20 + $0x40] sm:$0xff] %v1727_v58  ;;  %v1702_v38 = vmax.f32 %v1686_v3, 1e-24 }
 0x47d   : > { %v2745_v41 = vpop.eup %2744  ;;  %v1728_v25 = vmul.f32 %v2743_v37, %v3634_v16 }
 0x47e   : > { %v1729_v6 = vmul.f32 %v2745_v41, %v3641_v23  ;;  %2754 = vrsqrt.f32 %v1702_v38 }
 0x47f   : > { %1744 = vst [vmem:[%s3711_s20 + $0x48] sm:$0xff] %v1728_v25 }
 0x480   : > { %v2747_v13 = vpop.eup %2746  ;;  %1745 = vst [vmem:[%s3711_s20 + $0x50] sm:$0xff] %v1729_v6 }
 0x481   : > { %v2749_v43 = vpop.eup %2748  ;;  %v1730_v27 = vmul.f32 %v2747_v13, %v3646_v28 }
 0x482   : > { %v1731_v46 = vmul.f32 %v2749_v43, %v3653_v35 }
 0x483   : > { %1746 = vst [vmem:[%s3711_s20 + $0x58] sm:$0xff] %v1730_v27 }
 0x484   : > { %v2751_v47 = vpop.eup %2750  ;;  %1747 = vst [vmem:[%s3711_s20 + $0x60] sm:$0xff] %v1731_v46 }
 0x485   : > { %v2753_v16 = vpop.eup %2752  ;;  %v1732_v23 = vmul.f32 %v2751_v47, %v3658_v39 }
 0x486   : > { %v1733_v48 = vmul.f32 %v2753_v16, %v3663_v42 }
 0x487   : > { %1748 = vst [vmem:[%s3711_s20 + $0x68] sm:$0xff] %v1732_v23 }
 0x488   : > { %v2755_v49 = vpop.eup %2754  ;;  %1749 = vst [vmem:[%s3711_s20 + $0x70] sm:$0xff] %v1733_v48 }
 0x489   : > { %v1734_v51 = vmul.f32 %v2755_v49, %v3667_v44 }
 0x48b   : > { %1750 = vst [vmem:[%s3711_s20 + $0x78] sm:$0xff] %v1734_v51 }
 0x48c   : > { %2969 = shalt.err (!%p2966_p0)
}
 0x48d   : > { %s2970_s30 = scalar_lea.hbm %s3749_s8, 2048  ;;  %s2974_s2 = scalar_lea.hbm %s3859_s23, 4096 }
 0x48e   : > { %p2971_p2 = scmp.ne.s32.totalorder %s3749_s8, %s2970_s30  ;;  %p2975_p1 = scmp.lt.u32.totalorder %s3749_s8, %s3859_s23 }
 0x48f   : > { %p2976_p8 = scmp.lt.u32.totalorder %s2974_s2, %s2970_s30  ;;  %p2978_p3 = scmp.lt.u32.totalorder %s2970_s30, %s3749_s8 }
 0x490   : > { %p2972_p13 = pnand %p2971_p2, %p3309_p5 }
 0x491   : > { %p2977_p10 = por %p2976_p8, %p2975_p1 }
 0x492   : > { %p2973_p4 = pneg %p2972_p13 }
 0x493   : > { %p2979_p11 = por %p2978_p3, %p2977_p10 }
 0x495   : > { %p2980_p12 = pnand %p2979_p11, %p2973_p4 }
 0x497   : > { %2983 = shalt.err (!%p2980_p12)
}
 0x498   : > { %2626 = dma.vmem_to_hbm [thread:$0]  (%p3309_p5), %s3751_s11, 2048, %s3749_s8, %s1757_s19, %s3071_s4, %s3071_s4, %s3072_s26  }
 0x499 PF: > { %s3860_s0 = sld [smem:[#allocation24_spill]]  ;;  %s3861_s3 = sld [smem:[#allocation26_spill]] }
 0x49a   : > { %p3863_p7 = scmp.ge.s32.totalorder %s3058_s18, 2 }
 0x49f   : > { %s1801_s21 = sand.u32 1, %s3860_s0   ;;  %p3862_p6 = scmp.ne.s32.totalorder %s3861_s3, 0 }
 0x4a0   : > { %s1802_s24 = scalar_lea.sflag [#allocation5], %s1801_s21 }
 0x4a1   : > { %p2650_p9 = pnand %p3863_p7, %p3862_p6 }
 0x4a3   : > { %3029 = dma.done.wait (!%p2650_p9), %s1802_s24, 2048  }
 0x4a4   : > { %3031 = vsyncadd (!%p2650_p9), %s1802_s24, 4294965248  ;;  %s1811_s9 = scalar_lea.sflag [#allocation16], %s1801_s21 }
 0x4a5   : > { %3033 = dma.done.wait (!%p2650_p9), %s1811_s9, 2048  }
 0x4a6   : > { %3035 = vsyncadd (!%p2650_p9), %s1811_s9, 4294965248  ;;  %s35_s18 = sadd.s32 1, %s3058_s18   ;;  %s3864_s10 = smov %s3871_s13 }
 0x4a7   : > { %p32_p0 = scmp.ge.s32.totalorder %s35_s18, 4   ;;  %s3865_s13 = smov %s3042_s14 }
 0x4a8   : > { %s3866_s14 = smov %s3046_s15  ;;  %s3867_s15 = smov %s3321_s27 }
 0x4a9   : > { %s3868_s16 = smov %s3054_s17  ;;  %s3869_s17 = smov %s3864_s10 }
 0x4aa   :  { %34 = sbr.rel (!%p32_p0) target bundleno = 20 (0x14), region = 156 }
 0x4b1   :  { %1816 = vsyncpa [#allocation4], 1 }
 0x4b2   :  { %1818 = vsyncpa [#allocation4 + $0x1], 1 }
 0x4b3   :  { %1819 = vsyncpa [#allocation7], 1 }
 0x4b4   :  { %1821 = vsyncpa [#allocation7 + $0x1], 1 }
 0x4b5   :  { %1822 = vsyncpa [#allocation10], 1 }
 0x4b6   :  { %1823 = vsyncpa [#allocation13], 1 }
 0x4b7   :  { %1824 = vsyncpa [#allocation5], 1 }
 0x4b8   :  { %1826 = vsyncpa [#allocation5 + $0x1], 1 }
 0x4b9   :  { %1827 = vsyncpa [#allocation16], 1 }
 0x4ba   :  { %1829 = vsyncpa [#allocation16 + $0x1], 1 }

</bundles_post_ra>
